<compile_context>
chip_gen: v6e
topology: v6e:2x2x1
jax: 0.10.0
libtpu: 0.0.40
codegen_flags: <defaults>
</compile_context>

<pallas_src>
import functools

import jax
import jax.numpy as jnp
from jax import lax
from jax.experimental import pallas as pl
from jax.experimental.pallas import tpu as pltpu


# ------------------------------------------------------------------ helpers
def _erf_poly(x):
    # Abramowitz & Stegun 7.1.26, |abs err| < 1.5e-7.  Pure add/mul/div/exp ops.
    a1, a2, a3, a4, a5 = (0.254829592, -0.284496736, 1.421413741,
                          -1.453152027, 1.061405429)
    p = 0.3275911
    ax = jnp.abs(x)
    t = 1.0 / (1.0 + p * ax)
    poly = ((((a5 * t + a4) * t + a3) * t + a2) * t + a1) * t
    y = 1.0 - poly * jnp.exp(-ax * ax)
    return jnp.where(x >= 0.0, y, -y)


def _gelu_exact(x):
    # matches torch.nn.functional.gelu default (erf-based), up to ~1e-7
    return 0.5 * x * (1.0 + _erf_poly(x * 0.7071067811865476))


PARAM_ORDER = ["g1", "be1", "g2", "be2",
               "tw1", "tb1", "tw2", "tb2",
               "cw1t", "cb1", "cw2t", "cb2"]


# ------------------------------------------------------------------ kernel
def _mixer_block_kernel(x_ref,
                        g1_ref, be1_ref, g2_ref, be2_ref,
                        tw1_ref, tb1_ref, tw2_ref, tb2_ref,
                        cw1t_ref, cb1_ref, cw2t_ref, cb2_ref,
                        out_ref, *, eps):
    f32 = jnp.float32
    x = x_ref[0].astype(f32)                                     # (L, C)

    # ---- norm1: LayerNorm over the channel (lane) axis ----
    mu = jnp.mean(x, axis=-1, keepdims=True)
    var = jnp.mean((x - mu) ** 2, axis=-1, keepdims=True)
    y = (x - mu) * lax.rsqrt(var + eps) * g1_ref[...] + be1_ref[...]

    # ---- token mixing, transpose-free ----
    # torch: r = permute(fc2(gelu(fc1(permute(y)))))
    #  <=>   r = W2 @ gelu(W1 @ y + b1[:,None]) + b2[:,None]
    h = jnp.dot(tw1_ref[...], y, preferred_element_type=f32) + tb1_ref[...]   # (DS, C)
    h = _gelu_exact(h)
    r = jnp.dot(tw2_ref[...], h, preferred_element_type=f32) + tb2_ref[...]   # (L, C)
    x = x + r

    # ---- norm2 + channel mixing ----
    mu2 = jnp.mean(x, axis=-1, keepdims=True)
    var2 = jnp.mean((x - mu2) ** 2, axis=-1, keepdims=True)
    y2 = (x - mu2) * lax.rsqrt(var2 + eps) * g2_ref[...] + be2_ref[...]

    u = jnp.dot(y2, cw1t_ref[...], preferred_element_type=f32) + cb1_ref[...]  # (L, mlp)
    u = _gelu_exact(u)
    v = jnp.dot(u, cw2t_ref[...], preferred_element_type=f32) + cb2_ref[...]   # (L, C)

    out_ref[0] = (x + v).astype(out_ref.dtype)


# ------------------------------------------------------------------ wrapper
def mixer_block_forward(x, params, *, eps=1e-5):
    B, L, C = x.shape
    plist = [params[k] for k in PARAM_ORDER]

    in_specs = [pl.BlockSpec((1, L, C), lambda b: (b, 0, 0))]
    for w in plist:
        # grid-invariant weights: constant block index -> fetched once / reused
        in_specs.append(pl.BlockSpec(w.shape, lambda b, n=w.ndim: (0,) * n))

    return pl.pallas_call(
        functools.partial(_mixer_block_kernel, eps=eps),
        out_shape=jax.ShapeDtypeStruct((B, L, C), x.dtype),
        grid_spec=pltpu.PrefetchScalarGridSpec(
            num_scalar_prefetch=0,
            grid=(B,),
            in_specs=in_specs,
            out_specs=pl.BlockSpec((1, L, C), lambda b: (b, 0, 0)),
        ),
        compiler_params=pltpu.CompilerParams(
            dimension_semantics=("parallel",)),   # batch elements are independent
    )(x, *plist)


def mlp_mixer_forward(x, blocks, *, eps=1e-5):
    # MLPMixer = `depth` MixerBlocks applied sequentially
    for p in blocks:
        x = mixer_block_forward(x, p, eps=eps)
    return x


# ------------------------------------------------------------------ params
def init_mixer_block(key, num_token, emb_dim, DS, mlp_dim):
    ks = jax.random.split(key, 10)

    def lin_w(k, fan_out, fan_in):
        return jax.random.normal(k, (fan_out, fan_in), jnp.float32) * (1.0 / fan_in) ** 0.5

    def lin_b(k, fan_out, fan_in):
        return jax.random.normal(k, (fan_out,), jnp.float32) * (1.0 / fan_in) ** 0.5

    tw1 = lin_w(ks[0], DS, num_token)
    tb1 = lin_b(ks[1], DS, num_token)
    tw2 = lin_w(ks[2], num_token, DS)
    tb2 = lin_b(ks[3], num_token, DS)
    cw1 = lin_w(ks[4], mlp_dim, emb_dim)
    cb1 = lin_b(ks[5], mlp_dim, emb_dim)
    cw2 = lin_w(ks[6], emb_dim, mlp_dim)
    cb2 = lin_b(ks[7], emb_dim, mlp_dim)

    return dict(
        # LayerNorm affine params, perturbed away from (1, 0) to exercise them
        g1=1.0 + 0.1 * jax.random.normal(ks[8], (1, emb_dim), jnp.float32),
        be1=0.1 * jax.random.normal(ks[9], (1, emb_dim), jnp.float32),
        g2=jnp.ones((1, emb_dim), jnp.float32),
        be2=jnp.zeros((1, emb_dim), jnp.float32),
        # token-mixing MLP (acts on the token axis), kept in (out, in) layout
        tw1=tw1, tb1=tb1[:, None],            # (DS, L), (DS, 1)
        tw2=tw2, tb2=tb2[:, None],            # (L, DS), (L, 1)
        # channel-mixing MLP, weights pre-transposed for (tokens @ W) matmuls
        cw1t=cw1.T, cb1=cb1[None, :],         # (C, mlp), (1, mlp)
        cw2t=cw2.T, cb2=cb2[None, :],         # (mlp, C), (1, C)
    )


# ------------------------------------------------------------------ pure-JAX reference
def reference_mixer(x, blocks, *, eps=1e-5):
    x = x.astype(jnp.float32)
    for p in blocks:
        mu = x.mean(-1, keepdims=True)
        var = ((x - mu) ** 2).mean(-1, keepdims=True)
        y = (x - mu) / jnp.sqrt(var + eps) * p["g1"] + p["be1"]
        yt = jnp.swapaxes(y, 1, 2)                                 # (B, C, L)
        h = jax.nn.gelu(yt @ p["tw1"].T + p["tb1"][:, 0], approximate=False)
        r = h @ p["tw2"].T + p["tb2"][:, 0]                        # (B, C, L)
        x = x + jnp.swapaxes(r, 1, 2)

        mu2 = x.mean(-1, keepdims=True)
        var2 = ((x - mu2) ** 2).mean(-1, keepdims=True)
        y2 = (x - mu2) / jnp.sqrt(var2 + eps) * p["g2"] + p["be2"]
        u = jax.nn.gelu(y2 @ p["cw1t"] + p["cb1"], approximate=False)
        x = x + u @ p["cw2t"] + p["cb2"]
    return x


# ------------------------------------------------------------------ main
if __name__ == "__main__":
    key = jax.random.PRNGKey(0)
    kx, kp = jax.random.split(key)

    # MLPMixer(num_token, emb_dim, DS, mlp_dim, depth)
    B, num_token, emb_dim, DS, mlp_dim, depth = 2, 64, 128, 64, 256, 1
    x = jax.random.normal(kx, (B, num_token, emb_dim), jnp.float32)
    blocks = [init_mixer_block(k, num_token, emb_dim, DS, mlp_dim)
              for k in jax.random.split(kp, depth)]

    out = jax.jit(lambda xv: mlp_mixer_forward(xv, blocks))(x)
    out = jax.block_until_ready(out)

    assert out.shape == (B, num_token, emb_dim)
    assert bool(jnp.all(jnp.isfinite(out)))

    ref = reference_mixer(x, blocks)
    max_err = float(jnp.max(jnp.abs(out - ref)))
    assert max_err < 5e-3, f"mismatch vs reference: max abs diff {max_err}"

    print("KERNEL_OK")
</pallas_src>

<mosaic_0001>
module attributes {stable_mosaic.version = 11 : i64} {
  func.func @_mixer_block_kernel(%arg0: i32, %arg1: memref<1x64x128xf32, #tpu.memory_space<vmem>>, %arg2: memref<1x128xf32, #tpu.memory_space<vmem>>, %arg3: memref<1x128xf32, #tpu.memory_space<vmem>>, %arg4: memref<1x128xf32, #tpu.memory_space<vmem>>, %arg5: memref<1x128xf32, #tpu.memory_space<vmem>>, %arg6: memref<64x64xf32, #tpu.memory_space<vmem>>, %arg7: memref<64x1xf32, #tpu.memory_space<vmem>>, %arg8: memref<64x64xf32, #tpu.memory_space<vmem>>, %arg9: memref<64x1xf32, #tpu.memory_space<vmem>>, %arg10: memref<128x256xf32, #tpu.memory_space<vmem>>, %arg11: memref<1x256xf32, #tpu.memory_space<vmem>>, %arg12: memref<256x128xf32, #tpu.memory_space<vmem>>, %arg13: memref<1x128xf32, #tpu.memory_space<vmem>>, %arg14: memref<1x64x128xf32, #tpu.memory_space<vmem>>) attributes {dimension_semantics = [#tpu.dimension_semantics<parallel>], iteration_bounds = array<i64: 2>, scalar_prefetch = 0 : i64, scratch_operands = 0 : i64, tpu.core_type = #tpu.core_type<tc>, window_params = [{transform_indices = @transform_0, window_bounds = array<i64: 1, 64, 128>}, {pipeline_mode = #tpu.pipeline_mode<synchronous>, transform_indices = @transform_1, window_bounds = array<i64: 1, 128>}, {pipeline_mode = #tpu.pipeline_mode<synchronous>, transform_indices = @transform_2, window_bounds = array<i64: 1, 128>}, {pipeline_mode = #tpu.pipeline_mode<synchronous>, transform_indices = @transform_3, window_bounds = array<i64: 1, 128>}, {pipeline_mode = #tpu.pipeline_mode<synchronous>, transform_indices = @transform_4, window_bounds = array<i64: 1, 128>}, {pipeline_mode = #tpu.pipeline_mode<synchronous>, transform_indices = @transform_5, window_bounds = array<i64: 64, 64>}, {pipeline_mode = #tpu.pipeline_mode<synchronous>, transform_indices = @transform_6, window_bounds = array<i64: 64, 1>}, {pipeline_mode = #tpu.pipeline_mode<synchronous>, transform_indices = @transform_7, window_bounds = array<i64: 64, 64>}, {pipeline_mode = #tpu.pipeline_mode<synchronous>, transform_indices = @transform_8, window_bounds = array<i64: 64, 1>}, {pipeline_mode = #tpu.pipeline_mode<synchronous>, transform_indices = @transform_9, window_bounds = array<i64: 128, 256>}, {pipeline_mode = #tpu.pipeline_mode<synchronous>, transform_indices = @transform_10, window_bounds = array<i64: 1, 256>}, {pipeline_mode = #tpu.pipeline_mode<synchronous>, transform_indices = @transform_11, window_bounds = array<i64: 256, 128>}, {pipeline_mode = #tpu.pipeline_mode<synchronous>, transform_indices = @transform_12, window_bounds = array<i64: 1, 128>}, {transform_indices = @transform_13, window_bounds = array<i64: 1, 64, 128>}]} {
    %c0 = arith.constant 0 : index
    %c0_0 = arith.constant 0 : index
    %c0_1 = arith.constant 0 : index
    %0 = vector.load %arg1[%c0, %c0_0, %c0_1] : memref<1x64x128xf32, #tpu.memory_space<vmem>>, vector<1x64x128xf32>
    %1 = vector.shape_cast %0 : vector<1x64x128xf32> to vector<64x128xf32>
    %cst = arith.constant dense<0.000000e+00> : vector<64xf32>
    %2 = vector.multi_reduction <add>, %1, %cst [1] : vector<64x128xf32> to vector<64xf32>
    %3 = vector.shape_cast %2 : vector<64xf32> to vector<64x1xf32>
    %cst_2 = arith.constant 1.280000e+02 : f32
    %4 = vector.broadcast %cst_2 : f32 to vector<64x1xf32>
    %5 = arith.divf %3, %4 : vector<64x1xf32>
    %6 = vector.broadcast %5 : vector<64x1xf32> to vector<64x128xf32>
    %7 = arith.subf %1, %6 : vector<64x128xf32>
    %8 = arith.mulf %7, %7 : vector<64x128xf32>
    %cst_3 = arith.constant dense<0.000000e+00> : vector<64xf32>
    %9 = vector.multi_reduction <add>, %8, %cst_3 [1] : vector<64x128xf32> to vector<64xf32>
    %10 = vector.shape_cast %9 : vector<64xf32> to vector<64x1xf32>
    %cst_4 = arith.constant 1.280000e+02 : f32
    %11 = vector.broadcast %cst_4 : f32 to vector<64x1xf32>
    %12 = arith.divf %10, %11 : vector<64x1xf32>
    %13 = vector.broadcast %5 : vector<64x1xf32> to vector<64x128xf32>
    %14 = arith.subf %1, %13 : vector<64x128xf32>
    %cst_5 = arith.constant 9.99999974E-6 : f32
    %15 = vector.broadcast %cst_5 : f32 to vector<64x1xf32>
    %16 = arith.addf %12, %15 : vector<64x1xf32>
    %17 = math.rsqrt %16 : vector<64x1xf32>
    %18 = vector.broadcast %17 : vector<64x1xf32> to vector<64x128xf32>
    %19 = arith.mulf %14, %18 : vector<64x128xf32>
    %c0_6 = arith.constant 0 : index
    %c0_7 = arith.constant 0 : index
    %20 = vector.load %arg2[%c0_6, %c0_7] : memref<1x128xf32, #tpu.memory_space<vmem>>, vector<1x128xf32>
    %21 = vector.broadcast %20 : vector<1x128xf32> to vector<64x128xf32>
    %22 = arith.mulf %19, %21 : vector<64x128xf32>
    %c0_8 = arith.constant 0 : index
    %c0_9 = arith.constant 0 : index
    %23 = vector.load %arg3[%c0_8, %c0_9] : memref<1x128xf32, #tpu.memory_space<vmem>>, vector<1x128xf32>
    %24 = vector.broadcast %23 : vector<1x128xf32> to vector<64x128xf32>
    %25 = arith.addf %22, %24 : vector<64x128xf32>
    %c0_10 = arith.constant 0 : index
    %c0_11 = arith.constant 0 : index
    %26 = vector.load %arg6[%c0_10, %c0_11] : memref<64x64xf32, #tpu.memory_space<vmem>>, vector<64x64xf32>
    %cst_12 = arith.constant dense<0.000000e+00> : vector<64x128xf32>
    %27 = tpu.matmul %26, %25, %cst_12 {dimension_numbers = #tpu.dot_dimension_numbers<[1], [0], [0], [1], [0, 0, 1, 1], [], []>} : vector<64x64xf32>, vector<64x128xf32>, vector<64x128xf32> -> vector<64x128xf32>
    %c0_13 = arith.constant 0 : index
    %c0_14 = arith.constant 0 : index
    %28 = vector.load %arg7[%c0_13, %c0_14] : memref<64x1xf32, #tpu.memory_space<vmem>>, vector<64x1xf32>
    %29 = vector.broadcast %28 : vector<64x1xf32> to vector<64x128xf32>
    %30 = arith.addf %27, %29 : vector<64x128xf32>
    %cst_15 = arith.constant 5.000000e-01 : f32
    %31 = vector.broadcast %cst_15 : f32 to vector<64x128xf32>
    %32 = arith.mulf %31, %30 : vector<64x128xf32>
    %cst_16 = arith.constant 0.707106769 : f32
    %33 = vector.broadcast %cst_16 : f32 to vector<64x128xf32>
    %34 = arith.mulf %30, %33 : vector<64x128xf32>
    %35 = math.absf %34 : vector<64x128xf32>
    %cst_17 = arith.constant 0.327591091 : f32
    %36 = vector.broadcast %cst_17 : f32 to vector<64x128xf32>
    %37 = arith.mulf %36, %35 : vector<64x128xf32>
    %cst_18 = arith.constant 1.000000e+00 : f32
    %38 = vector.broadcast %cst_18 : f32 to vector<64x128xf32>
    %39 = arith.addf %38, %37 : vector<64x128xf32>
    %cst_19 = arith.constant 1.000000e+00 : f32
    %40 = vector.broadcast %cst_19 : f32 to vector<64x128xf32>
    %41 = arith.divf %40, %39 : vector<64x128xf32>
    %cst_20 = arith.constant 1.06140542 : f32
    %42 = vector.broadcast %cst_20 : f32 to vector<64x128xf32>
    %43 = arith.mulf %42, %41 : vector<64x128xf32>
    %cst_21 = arith.constant -1.45315206 : f32
    %44 = vector.broadcast %cst_21 : f32 to vector<64x128xf32>
    %45 = arith.addf %43, %44 : vector<64x128xf32>
    %46 = arith.mulf %45, %41 : vector<64x128xf32>
    %cst_22 = arith.constant 1.42141378 : f32
    %47 = vector.broadcast %cst_22 : f32 to vector<64x128xf32>
    %48 = arith.addf %46, %47 : vector<64x128xf32>
    %49 = arith.mulf %48, %41 : vector<64x128xf32>
    %cst_23 = arith.constant -0.284496725 : f32
    %50 = vector.broadcast %cst_23 : f32 to vector<64x128xf32>
    %51 = arith.addf %49, %50 : vector<64x128xf32>
    %52 = arith.mulf %51, %41 : vector<64x128xf32>
    %cst_24 = arith.constant 0.254829586 : f32
    %53 = vector.broadcast %cst_24 : f32 to vector<64x128xf32>
    %54 = arith.addf %52, %53 : vector<64x128xf32>
    %55 = arith.mulf %54, %41 : vector<64x128xf32>
    %cst_25 = arith.constant 0.000000e+00 : f32
    %56 = vector.broadcast %cst_25 : f32 to vector<64x128xf32>
    %57 = arith.subf %56, %35 : vector<64x128xf32>
    %58 = arith.mulf %57, %35 : vector<64x128xf32>
    %59 = math.exp %58 : vector<64x128xf32>
    %60 = arith.mulf %55, %59 : vector<64x128xf32>
    %cst_26 = arith.constant 1.000000e+00 : f32
    %61 = vector.broadcast %cst_26 : f32 to vector<64x128xf32>
    %62 = arith.subf %61, %60 : vector<64x128xf32>
    %cst_27 = arith.constant 0.000000e+00 : f32
    %63 = vector.broadcast %cst_27 : f32 to vector<64x128xf32>
    %64 = arith.cmpf oge, %34, %63 : vector<64x128xf32>
    %cst_28 = arith.constant 0.000000e+00 : f32
    %65 = vector.broadcast %cst_28 : f32 to vector<64x128xf32>
    %66 = arith.subf %65, %62 : vector<64x128xf32>
    %67 = arith.select %64, %62, %66 : vector<64x128xi1>, vector<64x128xf32>
    %cst_29 = arith.constant 1.000000e+00 : f32
    %68 = vector.broadcast %cst_29 : f32 to vector<64x128xf32>
    %69 = arith.addf %68, %67 : vector<64x128xf32>
    %70 = arith.mulf %32, %69 : vector<64x128xf32>
    %c0_30 = arith.constant 0 : index
    %c0_31 = arith.constant 0 : index
    %71 = vector.load %arg8[%c0_30, %c0_31] : memref<64x64xf32, #tpu.memory_space<vmem>>, vector<64x64xf32>
    %cst_32 = arith.constant dense<0.000000e+00> : vector<64x128xf32>
    %72 = tpu.matmul %71, %70, %cst_32 {dimension_numbers = #tpu.dot_dimension_numbers<[1], [0], [0], [1], [0, 0, 1, 1], [], []>} : vector<64x64xf32>, vector<64x128xf32>, vector<64x128xf32> -> vector<64x128xf32>
    %c0_33 = arith.constant 0 : index
    %c0_34 = arith.constant 0 : index
    %73 = vector.load %arg9[%c0_33, %c0_34] : memref<64x1xf32, #tpu.memory_space<vmem>>, vector<64x1xf32>
    %74 = vector.broadcast %73 : vector<64x1xf32> to vector<64x128xf32>
    %75 = arith.addf %72, %74 : vector<64x128xf32>
    %76 = arith.addf %1, %75 : vector<64x128xf32>
    %cst_35 = arith.constant dense<0.000000e+00> : vector<64xf32>
    %77 = vector.multi_reduction <add>, %76, %cst_35 [1] : vector<64x128xf32> to vector<64xf32>
    %78 = vector.shape_cast %77 : vector<64xf32> to vector<64x1xf32>
    %cst_36 = arith.constant 1.280000e+02 : f32
    %79 = vector.broadcast %cst_36 : f32 to vector<64x1xf32>
    %80 = arith.divf %78, %79 : vector<64x1xf32>
    %81 = vector.broadcast %80 : vector<64x1xf32> to vector<64x128xf32>
    %82 = arith.subf %76, %81 : vector<64x128xf32>
    %83 = arith.mulf %82, %82 : vector<64x128xf32>
    %cst_37 = arith.constant dense<0.000000e+00> : vector<64xf32>
    %84 = vector.multi_reduction <add>, %83, %cst_37 [1] : vector<64x128xf32> to vector<64xf32>
    %85 = vector.shape_cast %84 : vector<64xf32> to vector<64x1xf32>
    %cst_38 = arith.constant 1.280000e+02 : f32
    %86 = vector.broadcast %cst_38 : f32 to vector<64x1xf32>
    %87 = arith.divf %85, %86 : vector<64x1xf32>
    %88 = vector.broadcast %80 : vector<64x1xf32> to vector<64x128xf32>
    %89 = arith.subf %76, %88 : vector<64x128xf32>
    %cst_39 = arith.constant 9.99999974E-6 : f32
    %90 = vector.broadcast %cst_39 : f32 to vector<64x1xf32>
    %91 = arith.addf %87, %90 : vector<64x1xf32>
    %92 = math.rsqrt %91 : vector<64x1xf32>
    %93 = vector.broadcast %92 : vector<64x1xf32> to vector<64x128xf32>
    %94 = arith.mulf %89, %93 : vector<64x128xf32>
    %c0_40 = arith.constant 0 : index
    %c0_41 = arith.constant 0 : index
    %95 = vector.load %arg4[%c0_40, %c0_41] : memref<1x128xf32, #tpu.memory_space<vmem>>, vector<1x128xf32>
    %96 = vector.broadcast %95 : vector<1x128xf32> to vector<64x128xf32>
    %97 = arith.mulf %94, %96 : vector<64x128xf32>
    %c0_42 = arith.constant 0 : index
    %c0_43 = arith.constant 0 : index
    %98 = vector.load %arg5[%c0_42, %c0_43] : memref<1x128xf32, #tpu.memory_space<vmem>>, vector<1x128xf32>
    %99 = vector.broadcast %98 : vector<1x128xf32> to vector<64x128xf32>
    %100 = arith.addf %97, %99 : vector<64x128xf32>
    %c0_44 = arith.constant 0 : index
    %c0_45 = arith.constant 0 : index
    %101 = vector.load %arg10[%c0_44, %c0_45] : memref<128x256xf32, #tpu.memory_space<vmem>>, vector<128x256xf32>
    %cst_46 = arith.constant dense<0.000000e+00> : vector<64x256xf32>
    %102 = tpu.matmul %100, %101, %cst_46 {dimension_numbers = #tpu.dot_dimension_numbers<[1], [0], [0], [1], [0, 0, 1, 1], [], []>} : vector<64x128xf32>, vector<128x256xf32>, vector<64x256xf32> -> vector<64x256xf32>
    %c0_47 = arith.constant 0 : index
    %c0_48 = arith.constant 0 : index
    %103 = vector.load %arg11[%c0_47, %c0_48] : memref<1x256xf32, #tpu.memory_space<vmem>>, vector<1x256xf32>
    %104 = vector.broadcast %103 : vector<1x256xf32> to vector<64x256xf32>
    %105 = arith.addf %102, %104 : vector<64x256xf32>
    %cst_49 = arith.constant 5.000000e-01 : f32
    %106 = vector.broadcast %cst_49 : f32 to vector<64x256xf32>
    %107 = arith.mulf %106, %105 : vector<64x256xf32>
    %cst_50 = arith.constant 0.707106769 : f32
    %108 = vector.broadcast %cst_50 : f32 to vector<64x256xf32>
    %109 = arith.mulf %105, %108 : vector<64x256xf32>
    %110 = math.absf %109 : vector<64x256xf32>
    %cst_51 = arith.constant 0.327591091 : f32
    %111 = vector.broadcast %cst_51 : f32 to vector<64x256xf32>
    %112 = arith.mulf %111, %110 : vector<64x256xf32>
    %cst_52 = arith.constant 1.000000e+00 : f32
    %113 = vector.broadcast %cst_52 : f32 to vector<64x256xf32>
    %114 = arith.addf %113, %112 : vector<64x256xf32>
    %cst_53 = arith.constant 1.000000e+00 : f32
    %115 = vector.broadcast %cst_53 : f32 to vector<64x256xf32>
    %116 = arith.divf %115, %114 : vector<64x256xf32>
    %cst_54 = arith.constant 1.06140542 : f32
    %117 = vector.broadcast %cst_54 : f32 to vector<64x256xf32>
    %118 = arith.mulf %117, %116 : vector<64x256xf32>
    %cst_55 = arith.constant -1.45315206 : f32
    %119 = vector.broadcast %cst_55 : f32 to vector<64x256xf32>
    %120 = arith.addf %118, %119 : vector<64x256xf32>
    %121 = arith.mulf %120, %116 : vector<64x256xf32>
    %cst_56 = arith.constant 1.42141378 : f32
    %122 = vector.broadcast %cst_56 : f32 to vector<64x256xf32>
    %123 = arith.addf %121, %122 : vector<64x256xf32>
    %124 = arith.mulf %123, %116 : vector<64x256xf32>
    %cst_57 = arith.constant -0.284496725 : f32
    %125 = vector.broadcast %cst_57 : f32 to vector<64x256xf32>
    %126 = arith.addf %124, %125 : vector<64x256xf32>
    %127 = arith.mulf %126, %116 : vector<64x256xf32>
    %cst_58 = arith.constant 0.254829586 : f32
    %128 = vector.broadcast %cst_58 : f32 to vector<64x256xf32>
    %129 = arith.addf %127, %128 : vector<64x256xf32>
    %130 = arith.mulf %129, %116 : vector<64x256xf32>
    %cst_59 = arith.constant 0.000000e+00 : f32
    %131 = vector.broadcast %cst_59 : f32 to vector<64x256xf32>
    %132 = arith.subf %131, %110 : vector<64x256xf32>
    %133 = arith.mulf %132, %110 : vector<64x256xf32>
    %134 = math.exp %133 : vector<64x256xf32>
    %135 = arith.mulf %130, %134 : vector<64x256xf32>
    %cst_60 = arith.constant 1.000000e+00 : f32
    %136 = vector.broadcast %cst_60 : f32 to vector<64x256xf32>
    %137 = arith.subf %136, %135 : vector<64x256xf32>
    %cst_61 = arith.constant 0.000000e+00 : f32
    %138 = vector.broadcast %cst_61 : f32 to vector<64x256xf32>
    %139 = arith.cmpf oge, %109, %138 : vector<64x256xf32>
    %cst_62 = arith.constant 0.000000e+00 : f32
    %140 = vector.broadcast %cst_62 : f32 to vector<64x256xf32>
    %141 = arith.subf %140, %137 : vector<64x256xf32>
    %142 = arith.select %139, %137, %141 : vector<64x256xi1>, vector<64x256xf32>
    %cst_63 = arith.constant 1.000000e+00 : f32
    %143 = vector.broadcast %cst_63 : f32 to vector<64x256xf32>
    %144 = arith.addf %143, %142 : vector<64x256xf32>
    %145 = arith.mulf %107, %144 : vector<64x256xf32>
    %c0_64 = arith.constant 0 : index
    %c0_65 = arith.constant 0 : index
    %146 = vector.load %arg12[%c0_64, %c0_65] : memref<256x128xf32, #tpu.memory_space<vmem>>, vector<256x128xf32>
    %cst_66 = arith.constant dense<0.000000e+00> : vector<64x128xf32>
    %147 = tpu.matmul %145, %146, %cst_66 {dimension_numbers = #tpu.dot_dimension_numbers<[1], [0], [0], [1], [0, 0, 1, 1], [], []>} : vector<64x256xf32>, vector<256x128xf32>, vector<64x128xf32> -> vector<64x128xf32>
    %c0_67 = arith.constant 0 : index
    %c0_68 = arith.constant 0 : index
    %148 = vector.load %arg13[%c0_67, %c0_68] : memref<1x128xf32, #tpu.memory_space<vmem>>, vector<1x128xf32>
    %149 = vector.broadcast %148 : vector<1x128xf32> to vector<64x128xf32>
    %150 = arith.addf %147, %149 : vector<64x128xf32>
    %151 = arith.addf %76, %150 : vector<64x128xf32>
    %c0_69 = arith.constant 0 : index
    %c0_70 = arith.constant 0 : index
    %c0_71 = arith.constant 0 : index
    %152 = vector.load %arg14[%c0_69, %c0_70, %c0_71] : memref<1x64x128xf32, #tpu.memory_space<vmem>>, vector<1x64x128xf32>
    %153 = vector.shape_cast %152 : vector<1x64x128xf32> to vector<64x128xf32>
    %154 = vector.shape_cast %151 : vector<64x128xf32> to vector<1x64x128xf32>
    tpu.vector_store %arg14[%c0_69, %c0_70, %c0_71], %154 {strides = array<i32>} : memref<1x64x128xf32, #tpu.memory_space<vmem>>, vector<1x64x128xf32>,
    return
  }
  func.func @transform_0(%arg0: i32) -> (i32, i32, i32) {
    %c0_i32 = arith.constant 0 : i32
    %c0_i32_0 = arith.constant 0 : i32
    %c0_i32_1 = arith.constant 0 : i32
    return %arg0, %c0_i32, %c0_i32_0 : i32, i32, i32
  }
  func.func @transform_1(%arg0: i32) -> (i32, i32) {
    %c0_i32 = arith.constant 0 : i32
    %c0_i32_0 = arith.constant 0 : i32
    %c0_i32_1 = arith.constant 0 : i32
    return %c0_i32, %c0_i32_0 : i32, i32
  }
  func.func @transform_2(%arg0: i32) -> (i32, i32) {
    %c0_i32 = arith.constant 0 : i32
    %c0_i32_0 = arith.constant 0 : i32
    %c0_i32_1 = arith.constant 0 : i32
    return %c0_i32, %c0_i32_0 : i32, i32
  }
  func.func @transform_3(%arg0: i32) -> (i32, i32) {
    %c0_i32 = arith.constant 0 : i32
    %c0_i32_0 = arith.constant 0 : i32
    %c0_i32_1 = arith.constant 0 : i32
    return %c0_i32, %c0_i32_0 : i32, i32
  }
  func.func @transform_4(%arg0: i32) -> (i32, i32) {
    %c0_i32 = arith.constant 0 : i32
    %c0_i32_0 = arith.constant 0 : i32
    %c0_i32_1 = arith.constant 0 : i32
    return %c0_i32, %c0_i32_0 : i32, i32
  }
  func.func @transform_5(%arg0: i32) -> (i32, i32) {
    %c0_i32 = arith.constant 0 : i32
    %c0_i32_0 = arith.constant 0 : i32
    %c0_i32_1 = arith.constant 0 : i32
    return %c0_i32, %c0_i32_0 : i32, i32
  }
  func.func @transform_6(%arg0: i32) -> (i32, i32) {
    %c0_i32 = arith.constant 0 : i32
    %c0_i32_0 = arith.constant 0 : i32
    %c0_i32_1 = arith.constant 0 : i32
    return %c0_i32, %c0_i32_0 : i32, i32
  }
  func.func @transform_7(%arg0: i32) -> (i32, i32) {
    %c0_i32 = arith.constant 0 : i32
    %c0_i32_0 = arith.constant 0 : i32
    %c0_i32_1 = arith.constant 0 : i32
    return %c0_i32, %c0_i32_0 : i32, i32
  }
  func.func @transform_8(%arg0: i32) -> (i32, i32) {
    %c0_i32 = arith.constant 0 : i32
    %c0_i32_0 = arith.constant 0 : i32
    %c0_i32_1 = arith.constant 0 : i32
    return %c0_i32, %c0_i32_0 : i32, i32
  }
  func.func @transform_9(%arg0: i32) -> (i32, i32) {
    %c0_i32 = arith.constant 0 : i32
    %c0_i32_0 = arith.constant 0 : i32
    %c0_i32_1 = arith.constant 0 : i32
    return %c0_i32, %c0_i32_0 : i32, i32
  }
  func.func @transform_10(%arg0: i32) -> (i32, i32) {
    %c0_i32 = arith.constant 0 : i32
    %c0_i32_0 = arith.constant 0 : i32
    %c0_i32_1 = arith.constant 0 : i32
    return %c0_i32, %c0_i32_0 : i32, i32
  }
  func.func @transform_11(%arg0: i32) -> (i32, i32) {
    %c0_i32 = arith.constant 0 : i32
    %c0_i32_0 = arith.constant 0 : i32
    %c0_i32_1 = arith.constant 0 : i32
    return %c0_i32, %c0_i32_0 : i32, i32
  }
  func.func @transform_12(%arg0: i32) -> (i32, i32) {
    %c0_i32 = arith.constant 0 : i32
    %c0_i32_0 = arith.constant 0 : i32
    %c0_i32_1 = arith.constant 0 : i32
    return %c0_i32, %c0_i32_0 : i32, i32
  }
  func.func @transform_13(%arg0: i32) -> (i32, i32, i32) {
    %c0_i32 = arith.constant 0 : i32
    %c0_i32_0 = arith.constant 0 : i32
    %c0_i32_1 = arith.constant 0 : i32
    return %arg0, %c0_i32, %c0_i32_0 : i32, i32, i32
  }
}

</mosaic_0001>

<bundles_post_ra>
// kernel: _lambda_.1
= control target key start
LH: loop header
LB: loop body
LE: loop exit
PB: predicated region body
PF: predicated region fallthrough
CT: control target
= control target key end

     0   :  { %s4027_s0 = inlined_call_operand.hbm [shape: f32[2,64,128], index: 0, kind: input, shape index: {}]   ;;  %s4028_s1 = inlined_call_operand.vmem [shape: f32[1,128], index: 1, kind: input, shape index: {}]   ;;  %s4029_s2 = inlined_call_operand.vmem [shape: f32[1,128], index: 2, kind: input, shape index: {}]   ;;  %s4030_s3 = inlined_call_operand.vmem [shape: f32[1,128], index: 3, kind: input, shape index: {}]   ;;  %s4031_s4 = inlined_call_operand.vmem [shape: f32[1,128], index: 4, kind: input, shape index: {}]   ;;  %s4032_s5 = inlined_call_operand.hbm [shape: f32[64,64], index: 5, kind: input, shape index: {}]   ;;  %s4033_s6 = inlined_call_operand.hbm [shape: f32[64,1], index: 6, kind: input, shape index: {}]   ;;  %s4034_s7 = inlined_call_operand.hbm [shape: f32[64,64], index: 7, kind: input, shape index: {}]   ;;  %s4035_s8 = inlined_call_operand.hbm [shape: f32[64,1], index: 8, kind: input, shape index: {}]   ;;  %s4036_s9 = inlined_call_operand.hbm [shape: f32[128,256], index: 9, kind: input, shape index: {}]   ;;  %s4037_s10 = inlined_call_operand.vmem [shape: f32[1,256], index: 10, kind: input, shape index: {}]   ;;  %s4038_s11 = inlined_call_operand.hbm [shape: f32[256,128], index: 11, kind: input, shape index: {}]   ;;  %s4039_s12 = inlined_call_operand.vmem [shape: f32[1,128], index: 12, kind: input, shape index: {}]   ;;  %s4040_s13 = inlined_call_operand.hbm [shape: f32[2,64,128], index: 13, kind: output, shape index: {}]  }
   0x1   :  { %4070 = sst [smem:[#allocation44_spill]] %s4032_s5 }
   0x2   :  { %4071 = sst [smem:[#allocation45_spill]] %s4033_s6 }
   0x3   :  { %4072 = sst [smem:[#allocation46_spill]] %s4034_s7 }
   0x4   :  { %4073 = sst [smem:[#allocation47_spill]] %s4035_s8 }
   0x5   :  { %4074 = sst [smem:[#allocation48_spill]] %s4036_s9 }
   0x6   :  { %4075 = sst [smem:[#allocation49_spill]] %s4038_s11 }
   0x7   :  { %18 = vsyncpa [#allocation3], 0 }
   0x8   :  { %20 = vsyncpa [#allocation3 + $0x1], 0 }
   0x9   :  { %21 = vsyncpa [#allocation6], 0 }
   0xa   :  { %22 = vsyncpa [#allocation9], 0 }
   0xb   :  { %23 = vsyncpa [#allocation12], 0 }
   0xc   :  { %24 = vsyncpa [#allocation4], 0 }
   0xd   :  { %26 = vsyncpa [#allocation4 + $0x1], 0  ;;  %s3065_s25 = smov 0   ;;  %s3067_s26 = smov 0  }
   0xe   :  { %s3069_s27 = smov 0   ;;  %s3071_s28 = smov 0  }
   0xf LB: > { %4076 = sst [smem:[#allocation20_spill]] %s2973_s27  ;;  %s2979_s29 = smov [#allocation5]   ;;  %s2977_s28 = sphi %s3071_s28, %s4148_s28   ;;  %s2973_s27 = sphi %s3069_s27, %s4150_s27   ;;  %s2969_s26 = sphi %s3067_s26, %s4152_s26   ;;  %s2965_s25 = sphi %s3065_s25, %s4151_s25  }
  0x10   : > { %s365_s30 = sshll.u32 %s2979_s29, 4  ;;  %s3086_s14 = sadd.s32 4294967295, %s2977_s28   ;;  %s366_s30 = int_to_ptr.vmem [resolvable:$true] %s365_s30 }
  0x11   : > { %p2280_p0 = scmp.ge.s32.totalorder %s2977_s28, 1  ;;  %p4046_p1 = scmp.eq.s32.totalorder %s3086_s14, 0 }
  0x12   : > { %p341_p2 = scmp.lt.s32.totalorder %s2977_s28, 3  ;;  %s2980_s16 = smov [#allocation8]  }
  0x13   : > { %s391_s17 = sshll.u32 %s2980_s16, 4  ;;  %s2981_s19 = smov [#allocation11]   ;;  %s3104_s17 = int_to_ptr.vmem [resolvable:$true] %s391_s17 }
  0x14   : > { %p3091_p3 = pnand %p2280_p0, %p341_p2  ;;  %s417_s20 = sshll.u32 %s2981_s19, 4  ;;  %s3106_s20 = int_to_ptr.vmem [resolvable:$true] %s417_s20 }
  0x15   : > { %s2728_s22 = scalar_lea.vmem %s366_s30, 1024  ;;  %p2736_p11 = scmp.lt.s32.totalorder %s366_s30, %s366_s30 }
  0x16   : > { %s4077_s15 = scalar_select %p3091_p3, 1, 0 }
  0x17   : > { %p2500_p5 = pneg %p3091_p3  ;;  %p2729_p8 = scmp.ne.s32.totalorder %s366_s30, %s2728_s22 }
  0x18   : > { %p2737_p12 = scmp.lt.s32.totalorder %s2728_s22, %s2728_s22 }
  0x19   : > { %p3100_p6 = pnand %p2500_p5, %p4046_p1 }
  0x1a   : > { %p2738_p13 = por %p2737_p12, %p2736_p11 }
  0x1b   : > { %p3110_p7 = pneg %p3100_p6 }
  0x1d   : > { %p2731_p9 = pnand %p2729_p8, %p3110_p7 }
  0x1f   : > { %p2732_p10 = pneg %p2731_p9 }
  0x21   : > { %p2739_p0 = pnand %p2738_p13, %p2732_p10 }
  0x23   : > { %2742 = shalt.err (!%p2739_p0)
}
  0x24   : > { %s4041_s23 = smov 128   ;;  %s4043_s24 = smov 8  }
  0x25   : > { %s4080_s5 = sld [smem:[#allocation44_spill]]  ;;  %s2754_s19 = scalar_lea.vmem %s3104_s17, 1024 }
  0x26   : > { %p2755_p2 = scmp.ne.s32.totalorder %s3104_s17, %s2754_s19  ;;  %p2762_p9 = scmp.lt.s32.totalorder %s3104_s17, %s3104_s17 }
  0x27   : > { %p2763_p10 = scmp.lt.s32.totalorder %s2754_s19, %s2754_s19 }
  0x28   : > { %p2757_p5 = pnand %p2755_p2, %p3110_p7 }
  0x29   : > { %p2764_p11 = por %p2763_p10, %p2762_p9 }
  0x2a   : > { %p2758_p8 = pneg %p2757_p5 }
  0x2b   : > { %2503 = dma.hbm_to_vmem [thread:$0]  (!%p3100_p6), %s4080_s5, 1024, %s366_s30, [#allocation6], %s4041_s23, %s4041_s23, %s4043_s24  }
  0x2c   : > { %p2765_p12 = pnand %p2764_p11, %p2758_p8 }
  0x2e   : > { %2768 = shalt.err (!%p2765_p12)
}
  0x2f   : > { %s4081_s7 = sld [smem:[#allocation46_spill]]  ;;  %s2780_s30 = scalar_lea.vmem %s3106_s20, 4096 }
  0x30   : > { %p2781_p13 = scmp.ne.s32.totalorder %s3106_s20, %s2780_s30  ;;  %p2788_p5 = scmp.lt.s32.totalorder %s3106_s20, %s3106_s20 }
  0x31   : > { %p2789_p8 = scmp.lt.s32.totalorder %s2780_s30, %s2780_s30 }
  0x32   : > { %p2783_p0 = pnand %p2781_p13, %p3110_p7 }
  0x33   : > { %p2790_p9 = por %p2789_p8, %p2788_p5 }
  0x34   : > { %p2784_p2 = pneg %p2783_p0 }
  0x35   : > { %2509 = dma.hbm_to_vmem [thread:$0]  (!%p3100_p6), %s4081_s7, 1024, %s3104_s17, [#allocation9], %s4041_s23, %s4041_s23, %s4043_s24  }
  0x36   : > { %p2791_p10 = pnand %p2790_p9, %p2784_p2 }
  0x38   : > { %2794 = shalt.err (!%p2791_p10)
}
  0x39   : > { %s2984_s16 = smov 256   ;;  %s2985_s19 = smov 16  }
  0x3a   : > { %s4082_s9 = sld [smem:[#allocation48_spill]]  ;;  %s2986_s17 = smov [#allocation7]  }
  0x3b   : > { %s378_s23 = sshll.u32 %s2986_s17, 4  ;;  %s2987_s24 = smov [#allocation10]   ;;  %s379_s23 = int_to_ptr.vmem [resolvable:$true] %s378_s23 }
  0x3c   : > { %s404_s5 = sshll.u32 %s2987_s24, 4  ;;  %s2806_s7 = scalar_lea.vmem %s379_s23, 1024  ;;  %s405_s5 = int_to_ptr.vmem [resolvable:$true] %s404_s5 }
  0x3d   : > { %p2807_p11 = scmp.ne.s32.totalorder %s379_s23, %s2806_s7  ;;  %p2814_p0 = scmp.lt.s32.totalorder %s379_s23, %s379_s23 }
  0x3e   : > { %p2815_p2 = scmp.lt.s32.totalorder %s2806_s7, %s2806_s7 }
  0x3f   : > { %p2809_p12 = pnand %p2807_p11, %p3110_p7 }
  0x40   : > { %2515 = dma.hbm_to_vmem [thread:$0]  (!%p3100_p6), %s4082_s9, 4096, %s3106_s20, [#allocation12], %s2984_s16, %s2984_s16, %s2985_s19  }
  0x41   : > { %p2810_p13 = pneg %p2809_p12  ;;  %p2816_p5 = por %p2815_p2, %p2814_p0 }
  0x43   : > { %p2817_p8 = pnand %p2816_p5, %p2810_p13 }
  0x45   : > { %2820 = shalt.err (!%p2817_p8)
}
  0x46   : > { %s4083_s30 = smov 8   ;;  %s4084_s22 = smov 128  }
  0x47   : > { %s4085_s6 = sld [smem:[#allocation45_spill]]  ;;  %s2832_s24 = scalar_lea.vmem %s405_s5, 1024 }
  0x48   : > { %p2833_p9 = scmp.ne.s32.totalorder %s405_s5, %s2832_s24  ;;  %p2840_p12 = scmp.lt.s32.totalorder %s405_s5, %s405_s5 }
  0x49   : > { %p2841_p0 = scmp.lt.s32.totalorder %s2832_s24, %s2832_s24 }
  0x4a   : > { %p2835_p10 = pnand %p2833_p9, %p3110_p7 }
  0x4b   : > { %p2842_p13 = por %p2841_p0, %p2840_p12 }
  0x4c   : > { %p2836_p11 = pneg %p2835_p10 }
  0x4d   : > { %2506 = dma.hbm_to_vmem [thread:$0]  (!%p3100_p6), %s4085_s6, 1024, %s379_s23, [#allocation6], %s4084_s22, %s4084_s22, %s4083_s30  }
  0x4e   : > { %p2843_p2 = pnand %p2842_p13, %p2836_p11 }
  0x50   : > { %2846 = shalt.err (!%p2843_p2)
}
  0x51   : > { %s4086_s8 = sld [smem:[#allocation47_spill]]  ;;  %s2988_s23 = smov [#allocation13]  }
  0x52   : > { %s433_s29 = sshll.u32 %s2988_s23, 4  ;;  %s434_s29 = int_to_ptr.vmem [resolvable:$true] %s433_s29 }
  0x53   : > { %s2858_s17 = scalar_lea.vmem %s434_s29, 4096  ;;  %p2866_p10 = scmp.lt.s32.totalorder %s434_s29, %s434_s29 }
  0x54   : > { %p2859_p5 = scmp.ne.s32.totalorder %s434_s29, %s2858_s17  ;;  %p2867_p11 = scmp.lt.s32.totalorder %s2858_s17, %s2858_s17 }
  0x56   : > { %p2861_p8 = pnand %p2859_p5, %p3110_p7  ;;  %p2868_p12 = por %p2867_p11, %p2866_p10 }
  0x57   : > { %2512 = dma.hbm_to_vmem [thread:$0]  (!%p3100_p6), %s4086_s8, 1024, %s405_s5, [#allocation9], %s4084_s22, %s4084_s22, %s4083_s30  }
  0x58   : > { %p2862_p9 = pneg %p2861_p8 }
  0x5a   : > { %p2869_p0 = pnand %p2868_p12, %p2862_p9 }
  0x5c   : > { %2872 = shalt.err (!%p2869_p0)
}
  0x5d   : > { %s4087_s11 = sld [smem:[#allocation49_spill]]  ;;  %s2279_s18 = sadd.s32 4294967294, %s2977_s28  }
  0x5e   : > { %s3183_s21 = sadd.s32 1, %s2977_s28   ;;  %s39_s24 = sadd.s32 1, %s2973_s27 }
  0x5f   : > { %4088 = sst [smem:[#allocation21_spill]] %s3183_s21  ;;  %s36_s16 = ssub.s32 %s2977_s28, %s3183_s21 }
  0x60   : > { %p37_p7 = scmp.eq.s32.totalorder %s36_s16, 0  ;;  %p46_p13 = scmp.ne.s32.totalorder %s2973_s27, %s2969_s26 }
  0x61   : > { %p47_p2 = scmp.eq.s32.totalorder %s2977_s28, 0  ;;  %p52_p5 = scmp.ne.s32.totalorder %s2969_s26, %s2965_s25 }
  0x62   : > { %s3194_s7 = scalar_select %p37_p7, %s2973_s27, %s39_s24  }
  0x63   : > { %2518 = dma.hbm_to_vmem [thread:$0]  (!%p3100_p6), %s4087_s11, 4096, %s434_s29, [#allocation12], %s4084_s22, %s4084_s22, %s4083_s30  }
  0x64   : > { %4089 = sst [smem:[#allocation22_spill]] %s3194_s7  ;;  %p3196_p8 = por %p47_p2, %p46_p13 }
  0x65   : > { %p3202_p6 = por %p4046_p1, %p52_p5  ;;  %p328_p9 = scmp.eq.s32.totalorder %s3086_s14, 1 }
  0x66   : > { %p334_p10 = scmp.eq.s32.totalorder %s2279_s18, 1  ;;  %p2533_p11 = scmp.lt.s32.totalorder %s2977_s28, 2 }
  0x67   : > { %s4091_s23 = scalar_select %p3202_p6, 1, 0 }
  0x68   : > { %s450_s29 = sand.u32 1, %s2973_s27   ;;  %p3209_p12 = por %p328_p9, %p46_p13 }
  0x69   : > { %p3213_p0 = por %p334_p10, %p52_p5  ;;  %s2288_s5 = sshll.u32 %s450_s29, 6 }
  0x6a   : > { %s4092_s17 = scalar_select %p3209_p12, 1, 0 }
  0x6b   : > { %s4093_s20 = scalar_select %p3213_p0, 1, 0 }
  0x6c   : > { %s2326_s16 = sshll.u32 %s2977_s28, 10  ;;  %s454_s18 = scalar_lea.vmem [#allocation2], %s2288_s5 }
  0x6d   : > { %s3221_s8 = scalar_lea.hbm %s4027_s0, %s2326_s16  ;;  %s461_s9 = sshll.u32 %s454_s18, 4  ;;  %s3223_s9 = int_to_ptr.vmem [resolvable:$true] %s461_s9 }
  0x6e   : > { %p3227_p7 = pnand %p2533_p11, %p3196_p8  ;;  %s3231_s7 = scalar_lea.sflag [#allocation3], %s450_s29 }
  0x6f   : > { %s2873_s27 = scalar_lea.hbm %s3221_s8, 1024  ;;  %s2878_s5 = scalar_lea.hbm %s4027_s0, 2048 }
  0x70   : > { %p2874_p13 = scmp.ne.s32.totalorder %s3221_s8, %s2873_s27  ;;  %p2875_p2 = pneg %p3227_p7 }
  0x71   : > { %p2879_p8 = scmp.lt.s32.totalorder %s3221_s8, %s4027_s0  ;;  %p2880_p10 = scmp.lt.s32.totalorder %s2878_s5, %s2873_s27 }
  0x72   : > { %p2876_p5 = pnand %p2875_p2, %p2874_p13 }
  0x73   : > { %p2881_p11 = por %p2880_p10, %p2879_p8 }
  0x74   : > { %p2877_p9 = pneg %p2876_p5 }
  0x76   : > { %p2882_p4 = pnand %p2881_p11, %p2877_p9 }
  0x78   : > { %2885 = shalt.err (!%p2882_p4)
}
  0x79   : > { %s2886_s19 = scalar_lea.vmem %s3223_s9, 1024  ;;  %s2989_s29 = smov [#allocation2]  }
  0x7a   : > { %p2887_p1 = scmp.ne.s32.totalorder %s3223_s9, %s2886_s19  ;;  %s2891_s21 = sshll.u32 %s2989_s29, 4  ;;  %s2892_s21 = int_to_ptr.vmem [resolvable:$false] %s2891_s21 }
  0x7b   : > { %s2893_s6 = scalar_lea.vmem %s2892_s21, 2048  ;;  %p2894_p5 = scmp.lt.s32.totalorder %s3223_s9, %s2892_s21 }
  0x7c   : > { %p2889_p0 = pnand %p2887_p1, %p2875_p2  ;;  %p2895_p12 = scmp.lt.s32.totalorder %s2893_s6, %s2886_s19 }
  0x7e   : > { %p2890_p13 = pneg %p2889_p0  ;;  %p2896_p6 = por %p2895_p12, %p2894_p5 }
  0x80   : > { %p2897_p3 = pnand %p2896_p6, %p2890_p13 }
  0x82   : > { %2900 = shalt.err (!%p2897_p3)
}
  0x83   : > { %2522 = dma.hbm_to_vmem [thread:$0]  (!%p3227_p7), %s3221_s8, 1024, %s3223_s9, %s3231_s7, %s4084_s22, %s4084_s22, %s4083_s30  }
  0x84   : > { %p4095_p1 = scmp.ne.s32.totalorder %s4077_s15, 0 }
  0x86   : > { %473 = sbr.rel (%p4095_p1) target bundleno = 1786 (0x6fa), region = 72 }
  0x8b   : > { %s3258_s27 = sand.u32 1, %s2969_s26   ;;  %p4096_p3 = scmp.ne.s32.totalorder %s4091_s23, 0 }
  0x8c   : > { %s2292_s21 = sshll.u32 %s3258_s27, 6  ;;  %s476_s16 = scalar_lea.sflag [#allocation3], %s3258_s27 }
  0x8d   : > { %s479_s11 = scalar_lea.vmem [#allocation2], %s2292_s21 }
  0x8e   : > { %2944 = dma.done.wait (%p4096_p3), %s476_s16, 1024  }
  0x8f   : > { %2946 = vsyncadd (%p4096_p3), %s476_s16, 4294966272  ;;  %p4097_p4 = scmp.eq.s32.totalorder %s3086_s14, 0 }
  0x91   : > { %2948 = dma.done.wait (%p4097_p4), [#allocation6], 2048   ;;  %p4098_p6 = pmov %p4097_p4 }
  0x92   : > { %p4099_p12 = pmov %p4097_p4 }
  0x93   : > { %2950 = vsyncadd (%p4098_p6), [#allocation6], 4294965248 }
  0x94   : > { %2952 = dma.done.wait (%p4099_p12), [#allocation9], 2048   ;;  %p4100_p0 = pmov %p4097_p4 }
  0x96   : > { %2954 = vsyncadd (%p4100_p0), [#allocation9], 4294965248  ;;  %p4101_p7 = pmov %p4100_p0 }
  0x97   : > { %p4102_p2 = pmov %p4100_p0 }
  0x98   : > { %2956 = dma.done.wait (%p4101_p7), [#allocation12], 8192  }
  0x99   : > { %2958 = vsyncadd (%p4102_p2), [#allocation12], 4294959104  ;;  %v3280_v0 = vld [vmem:[%s479_s11 + $0x38] sm:$0xff]  ;;  %v3282_v1 = vld [vmem:[%s479_s11 + $0x28] sm:$0xff]  ;;  %vm729_vm0 = vcmask 523264   ;;  %v2990_v42 = vmov 0  }
  0x9a   : > { %568 = vadd.xlane.f32.xlu0 %v3280_v0  ;;  %564 = vadd.xlane.f32.xlu1 %v3282_v1  ;;  %v3286_v2 = vld [vmem:[%s479_s11 + $0x30] sm:$0xff]  ;;  %v3288_v3 = vld [vmem:[%s479_s11 + $0x20] sm:$0xff]  ;;  %v3292_v4 = vld [vmem:[%s479_s11 + $0x18] sm:$0xff]  ;;  %s3960_s6 = scalar_lea.vmem [#allocation14], %s2292_s21  ;;  %s2327_s21 = sshll.u32 %s3086_s14, 10 }
  0x9b   : > { %v3294_v5 = vld [vmem:[%s479_s11 + $0x10] sm:$0xff]  ;;  %v3298_v6 = vld [vmem:[%s479_s11 + $0x8] sm:$0xff]  ;;  %v3300_v7 = vld [vmem:[%s479_s11] sm:$0xff]  ;;  %2588 = vset.pattern.permute.xlu1 %v2990_v42  ;;  %2587 = vset.pattern.permute.xlu0 %v2990_v42  ;;  %s2149_s16 = sshll.u32 %s3960_s6, 4  ;;  %s3980_s9 = scalar_lea.hbm %s4040_s13, %s2327_s21  ;;  %s3982_s16 = int_to_ptr.vmem [resolvable:$true] %s2149_s16 }
  0x9c   : > { %v673_v40 = vld [vmem:[#allocation5] sm:$0xff]  ;;  %v687_v41 = vld [vmem:[#allocation7 + $0x30] sm:$0xff]  ;;  %v686_v43 = vld [vmem:[#allocation7 + $0x28] sm:$0xff]  ;;  %s2136_s15 = scalar_lea.sflag [#allocation4], %s3258_s27  ;;  %s2901_s30 = scalar_lea.vmem %s3982_s16, 1024 }
  0x9d   : > { %2432 = vmatprep.mubr.msk.f32.mxu0 %vm729_vm0, %v673_v40  ;;  %v688_v44 = vld [vmem:[#allocation7 + $0x38] sm:$0xff]  ;;  %v1084_v45 = vld [vmem:[#allocation10 + $0x8] sm:$0xff]  ;;  %v685_v46 = vld [vmem:[#allocation7 + $0x20] sm:$0xff]  ;;  %p2902_p9 = scmp.ne.s32.totalorder %s3982_s16, %s2901_s30  ;;  %p4145_p8 = scmp.ne.s32.totalorder %s4092_s17, 0 }
  0x9e   : > { %566 = vadd.xlane.f32.xlu0 %v3286_v2  ;;  %562 = vadd.xlane.f32.xlu1 %v3288_v3  ;;  %v1086_v47 = vld [vmem:[#allocation10 + $0x18] sm:$0xff]  ;;  %v1088_v49 = vld [vmem:[#allocation10 + $0x28] sm:$0xff]  ;;  %v683_v50 = vld [vmem:[#allocation7 + $0x10] sm:$0xff]  ;;  %s2992_s14 = smov [#allocation14]  }
  0x9f   : > { %v684_v48 = vld [vmem:[#allocation7 + $0x18] sm:$0xff]  ;;  %v682_v52 = vld [vmem:[#allocation7 + $0x8] sm:$0xff]  ;;  %v681_v53 = vld [vmem:[#allocation7] sm:$0xff]  ;;  %p2903_p10 = pnand %p2902_p9, %p4145_p8  ;;  %s2905_s22 = sshll.u32 %s2992_s14, 4  ;;  %s2906_s22 = int_to_ptr.vmem [resolvable:$false] %s2905_s22 }
  0xa0   : > { %v1090_v51 = vld [vmem:[#allocation10 + $0x38] sm:$0xff]  ;;  %v1083_v54 = vld [vmem:[#allocation10] sm:$0xff]  ;;  %v1085_v55 = vld [vmem:[#allocation10 + $0x10] sm:$0xff]  ;;  %s2907_s7 = scalar_lea.vmem %s2906_s22, 2048  ;;  %p2908_p13 = scmp.lt.s32.totalorder %s3982_s16, %s2906_s22 }
  0xa1   : > { %v1087_v56 = vld [vmem:[#allocation10 + $0x20] sm:$0xff]  ;;  %v1089_v57 = vld [vmem:[#allocation10 + $0x30] sm:$0xff]  ;;  %p2904_p11 = pneg %p2903_p10  ;;  %p2909_p5 = scmp.lt.s32.totalorder %s2907_s7, %s2901_s30 }
  0xa2   : > { %560 = vadd.xlane.f32.xlu0 %v3292_v4  ;;  %558 = vadd.xlane.f32.xlu1 %v3294_v5 }
  0xa3   : > { %p2910_p1 = por %p2909_p5, %p2908_p13 }
  0xa5   : > { %p2911_p3 = pnand %p2910_p1, %p2904_p11 }
  0xa6   : > { %556 = vadd.xlane.f32.xlu0 %v3298_v6  ;;  %554 = vadd.xlane.f32.xlu1 %v3300_v7 }
 0x123   : > { %v569_v8 = vpop.xlane.xlu0 %568  ;;  %v565_v9 = vpop.xlane.xlu1 %564 }
 0x124   : > { %v578_v10 = vmul.f32 0.0078125, %v569_v8  ;;  %v576_v11 = vmul.f32 0.0078125, %v565_v9 }
 0x126   : > { %v3305_v12 = vsub.f32 %v3280_v0, %v578_v10  ;;  %v3308_v13 = vsub.f32 %v3282_v1, %v576_v11 }
 0x127   : > { %v567_v14 = vpop.xlane.xlu0 %566  ;;  %v563_v15 = vpop.xlane.xlu1 %562 }
 0x128   : > { %v577_v16 = vmul.f32 0.0078125, %v567_v14  ;;  %v594_v17 = vmul.f32 %v3305_v12, %v3305_v12  ;;  %v575_v18 = vmul.f32 0.0078125, %v563_v15  ;;  %v592_v21 = vmul.f32 %v3308_v13, %v3308_v13 }
 0x12a   : > { %v3313_v19 = vsub.f32 %v3286_v2, %v577_v16  ;;  %609 = vadd.xlane.f32.xlu0 %v594_v17  ;;  %v3316_v20 = vsub.f32 %v3288_v3, %v575_v18 }
 0x12b   : > { %v561_v22 = vpop.xlane.xlu0 %560  ;;  %v559_v23 = vpop.xlane.xlu1 %558 }
 0x12c   : > { %v574_v24 = vmul.f32 0.0078125, %v561_v22  ;;  %v593_v25 = vmul.f32 %v3313_v19, %v3313_v19  ;;  %v573_v26 = vmul.f32 0.0078125, %v559_v23  ;;  %v591_v29 = vmul.f32 %v3316_v20, %v3316_v20 }
 0x12e   : > { %v3323_v27 = vsub.f32 %v3292_v4, %v574_v24  ;;  %605 = vadd.xlane.f32.xlu0 %v592_v21  ;;  %607 = vadd.xlane.f32.xlu1 %v593_v25  ;;  %v3326_v28 = vsub.f32 %v3294_v5, %v573_v26 }
 0x12f   : > { %v557_v30 = vpop.xlane.xlu0 %556  ;;  %v555_v31 = vpop.xlane.xlu1 %554 }
 0x130   : > { %v572_v32 = vmul.f32 0.0078125, %v557_v30  ;;  %v590_v33 = vmul.f32 %v3323_v27, %v3323_v27  ;;  %v571_v34 = vmul.f32 0.0078125, %v555_v31  ;;  %v589_v37 = vmul.f32 %v3326_v28, %v3326_v28 }
 0x132   : > { %v3333_v35 = vsub.f32 %v3298_v6, %v572_v32  ;;  %601 = vadd.xlane.f32.xlu0 %v590_v33  ;;  %603 = vadd.xlane.f32.xlu1 %v591_v29  ;;  %v3336_v36 = vsub.f32 %v3300_v7, %v571_v34  ;;  %v2300_v32 = vld [vmem:[%s4028_s1] ss:$0 sm:$0xff] }
 0x134   : > { %v588_v38 = vmul.f32 %v3333_v35, %v3333_v35  ;;  %v587_v39 = vmul.f32 %v3336_v36, %v3336_v36 }
 0x136   : > { %597 = vadd.xlane.f32.xlu0 %v588_v38  ;;  %599 = vadd.xlane.f32.xlu1 %v589_v37  ;;  %v2301_v37 = vld [vmem:[%s4029_s2] ss:$0 sm:$0xff] }
 0x13a   : > { %595 = vadd.xlane.f32.xlu1 %v587_v39 }
 0x14b   : > { %721 = vperm.xlu1 %2588, %v687_v41  }
 0x14c   : > { %726 = vperm.xlu0 %2587, %v688_v44  }
 0x14f   : > { %716 = vperm.xlu1 %2588, %v686_v43  }
 0x150   : > { %1098 = vperm.xlu0 %2587, %v1084_v45  }
 0x153   : > { %711 = vperm.xlu1 %2588, %v685_v46  }
 0x154   : > { %1108 = vperm.xlu0 %2587, %v1086_v47  }
 0x157   : > { %706 = vperm.xlu1 %2588, %v684_v48  }
 0x158   : > { %1118 = vperm.xlu0 %2587, %v1088_v49  }
 0x15b   : > { %701 = vperm.xlu1 %2588, %v683_v50  }
 0x15c   : > { %1128 = vperm.xlu0 %2587, %v1090_v51  }
 0x15f   : > { %696 = vperm.xlu1 %2588, %v682_v52  }
 0x163   : > { %691 = vperm.xlu1 %2588, %v681_v53  }
 0x167   : > { %1093 = vperm.xlu1 %2588, %v1083_v54  }
 0x16b   : > { %1103 = vperm.xlu1 %2588, %v1085_v55  }
 0x16f   : > { %1113 = vperm.xlu1 %2588, %v1087_v56  }
 0x173   : > { %1123 = vperm.xlu1 %2588, %v1089_v57  }
 0x1b3   : > { %v610_v58 = vpop.xlane.xlu0 %609 }
 0x1b4   : > { %v618_v59 = vmul.f32 0.0078125, %v610_v58 }
 0x1b6   : > { %v626_v60 = vadd.f32 1e-05, %v618_v59 }
 0x1b7   : > { %v606_v61 = vpop.xlane.xlu0 %605  ;;  %v608_v62 = vpop.xlane.xlu1 %607 }
 0x1b8   : > { %2589 = vrsqrt.f32 %v626_v60  ;;  %v616_v63 = vmul.f32 0.0078125, %v606_v61  ;;  %v617_v8 = vmul.f32 0.0078125, %v608_v62  ;;  %v675_v62 = vld [vmem:[#allocation5 + $0x10] sm:$0xff] }
 0x1ba   : > { %v624_v9 = vadd.f32 1e-05, %v616_v63  ;;  %v625_v10 = vadd.f32 1e-05, %v617_v8  ;;  %v676_v63 = vld [vmem:[#allocation5 + $0x18] sm:$0xff]  ;;  %v678_v8 = vld [vmem:[#allocation5 + $0x28] sm:$0xff] }
 0x1bb   : > { %v602_v11 = vpop.xlane.xlu0 %601  ;;  %v604_v14 = vpop.xlane.xlu1 %603 }
 0x1bc   : > { %2591 = vrsqrt.f32 %v624_v9  ;;  %v614_v15 = vmul.f32 0.0078125, %v602_v11  ;;  %v615_v16 = vmul.f32 0.0078125, %v604_v14  ;;  %v679_v9 = vld [vmem:[#allocation5 + $0x30] sm:$0xff]  ;;  %v1075_v11 = vld [vmem:[#allocation8] sm:$0xff] }
 0x1bd   : > { %2593 = vrsqrt.f32 %v625_v10  ;;  %v680_v10 = vld [vmem:[#allocation5 + $0x38] sm:$0xff]  ;;  %2460 = vmatprep.mubr.msk.f32.mxu1 %vm729_vm0, %v1075_v11 }
 0x1be   : > { %v622_v17 = vadd.f32 1e-05, %v614_v15  ;;  %v623_v18 = vadd.f32 1e-05, %v615_v16 }
 0x1bf   : > { %v598_v21 = vpop.xlane.xlu0 %597  ;;  %v600_v22 = vpop.xlane.xlu1 %599 }
 0x1c0   : > { %2595 = vrsqrt.f32 %v622_v17  ;;  %v612_v23 = vmul.f32 0.0078125, %v598_v21  ;;  %v613_v24 = vmul.f32 0.0078125, %v600_v22 }
 0x1c1   : > { %2597 = vrsqrt.f32 %v623_v18 }
 0x1c2   : > { %v620_v25 = vadd.f32 1e-05, %v612_v23  ;;  %v621_v26 = vadd.f32 1e-05, %v613_v24 }
 0x1c3   : > { %v596_v29 = vpop.xlane.xlu1 %595 }
 0x1c4   : > { %2599 = vrsqrt.f32 %v620_v25  ;;  %v611_v30 = vmul.f32 0.0078125, %v596_v29 }
 0x1c5   : > { %v2590_v31 = vpop.eup %2589  ;;  %2601 = vrsqrt.f32 %v621_v26 }
 0x1c6   : > { %v619_v33 = vadd.f32 1e-05, %v611_v30  ;;  %v642_v34 = vmul.f32 %v2590_v31, %v3305_v12 }
 0x1c7   : > { %v722_v14 = vpop.permute.xlu1 %721 }
 0x1c8   : > { %2603 = vrsqrt.f32 %v619_v33  ;;  %v657_v38 = vmul.f32 %v2300_v32, %v642_v34 }
 0x1c9   : > { %v2592_v39 = vpop.eup %2591 }
 0x1ca   : > { %v2594_v40 = vpop.eup %2593  ;;  %v672_v41 = vadd.f32 %v2301_v37, %v657_v38  ;;  %v640_v42 = vmul.f32 %v2592_v39, %v3308_v13 }
 0x1cb   : > { %v641_v43 = vmul.f32 %v2594_v40, %v3313_v19  ;;  %v717_v15 = vpop.permute.xlu1 %716 }
 0x1cc   : > { %2416 = vmatprep.subr.mxu0 %v672_v41  ;;  %v655_v46 = vmul.f32 %v2300_v32, %v640_v42 }
 0x1cd   : > { %v2596_v44 = vpop.eup %2595  ;;  %2417 = vmatpush3.msra.mxu0 %v672_v41  ;;  %v656_v45 = vmul.f32 %v2300_v32, %v641_v43 }
 0x1ce   : > { %v2598_v47 = vpop.eup %2597  ;;  %v638_v12 = vmul.f32 %v2596_v44, %v3323_v27  ;;  %v670_v51 = vadd.f32 %v2301_v37, %v655_v46 }
 0x1cf   : > { %v671_v48 = vadd.f32 %v2301_v37, %v656_v45  ;;  %v639_v49 = vmul.f32 %v2598_v47, %v3316_v20  ;;  %v712_v16 = vpop.permute.xlu1 %711 }
 0x1d0   : > { %v653_v53 = vmul.f32 %v2300_v32, %v638_v12 }
 0x1d1   : > { %v2600_v50 = vpop.eup %2599  ;;  %2418 = vmatprep.subr.mxu0 %v671_v48  ;;  %v654_v52 = vmul.f32 %v2300_v32, %v639_v49 }
 0x1d2   : > { %v2602_v54 = vpop.eup %2601  ;;  %2419 = vmatpush3.msra.mxu0 %v671_v48  ;;  %v636_v13 = vmul.f32 %v2600_v50, %v3333_v35  ;;  %v668_v27 = vadd.f32 %v2301_v37, %v653_v53 }
 0x1d3   : > { %2420 = vmatprep.subr.mxu0 %v670_v51  ;;  %v669_v19 = vadd.f32 %v2301_v37, %v654_v52  ;;  %v637_v55 = vmul.f32 %v2602_v54, %v3326_v28  ;;  %v674_v28 = vld [vmem:[#allocation5 + $0x8] sm:$0xff]  ;;  %v707_v17 = vpop.permute.xlu1 %706 }
 0x1d4   : > { %2421 = vmatpush3.msra.mxu0 %v670_v51  ;;  %v651_v58 = vmul.f32 %v2300_v32, %v636_v13 }
 0x1d5   : > { %v2604_v56 = vpop.eup %2603  ;;  %2422 = vmatprep.subr.mxu0 %v669_v19  ;;  %v652_v57 = vmul.f32 %v2300_v32, %v637_v55  ;;  %v727_v55 = vpop.permute.xlu0 %726 }
 0x1d6   : > { %2423 = vmatpush3.msra.mxu0 %v669_v19  ;;  %v635_v20 = vmul.f32 %v2604_v56, %v3336_v36  ;;  %v666_v61 = vadd.f32 %v2301_v37, %v651_v58  ;;  %v677_v36 = vld [vmem:[#allocation5 + $0x20] sm:$0xff] }
 0x1d7   : > { %2424 = vmatprep.subr.mxu0 %v668_v27  ;;  %v667_v59 = vadd.f32 %v2301_v37, %v652_v57  ;;  %v702_v18 = vpop.permute.xlu1 %701 }
 0x1d8   : > { %2425 = vmatpush3.msra.mxu0 %v668_v27  ;;  %v650_v60 = vmul.f32 %v2300_v32, %v635_v20 }
 0x1d9   : > { %2426 = vmatprep.subr.mxu0 %v667_v59 }
 0x1da   : > { %2427 = vmatpush3.msra.mxu0 %v667_v59  ;;  %v665_v35 = vadd.f32 %v2301_v37, %v650_v60 }
 0x1db   : > { %2428 = vmatprep.subr.mxu0 %v666_v61  ;;  %v697_v21 = vpop.permute.xlu1 %696 }
 0x1dc   : > { %2429 = vmatpush3.msra.mxu0 %v666_v61 }
 0x1dd   : > { %2430 = vmatprep.subr.mxu0 %v665_v35 }
 0x1de   : > { %2431 = vmatpush3.msra.mxu0 %v665_v35 }
 0x1df   : > { %2433 = vmatmul.mubr.msk.f32.vlgmr.msra.gmra.mxu0 %vm729_vm0, %v674_v28  ;;  %v692_v24 = vpop.permute.xlu1 %691 }
 0x1e0   : > { %2435 = vmatprep.mubr.msk.f32.mxu0 %vm729_vm0, %v675_v62 }
 0x1e3   : > { %2436 = vmatmul.mubr.msk.f32.gmra.mxu0 %vm729_vm0, %v676_v63 }
 0x1e4   : > { %2438 = vmatprep.mubr.msk.f32.mxu0 %vm729_vm0, %v677_v36 }
 0x1e7   : > { %2439 = vmatmul.mubr.msk.f32.gmra.mxu0 %vm729_vm0, %v678_v8 }
 0x1e8   : > { %2441 = vmatprep.mubr.msk.f32.mxu0 %vm729_vm0, %v679_v9 }
 0x1eb   : > { %2442 = vmatmul.mubr.msk.f32.gmra.mxu0 %vm729_vm0, %v680_v10 }
 0x29f   : > { %v2434_v22 = vpop.f32.mrf.mxu0 }
 0x2a0   : > { %v3367_v23 = vadd.f32 %v2434_v22, %v697_v21 }
 0x2a1   : > { %v820_v25 = vpop.f32.mrf.mxu0 }
 0x2a2   : > { %v3370_v26 = vmul.f32 0.70710677, %v3367_v23  ;;  %v3372_v29 = vadd.f32 %v820_v25, %v692_v24 }
 0x2a3   : > { %v2437_v30 = vpop.f32.mrf.mxu0 }
 0x2a4   : > { %v876_v31 = vand.u32 2147483647, %v3370_v26  ;;  %v3376_v32 = vmul.f32 0.70710677, %v3372_v29  ;;  %v3378_v33 = vadd.f32 %v2437_v30, %v707_v17  ;;  %vm1036_vm7 = vcmp.ge.f32.partialorder %v3370_v26, 0.0 }
 0x2a5   : > { %v830_v34 = vpop.f32.mrf.mxu0 }
 0x2a6   : > { %v884_v37 = vmul.f32 0.3275911, %v876_v31  ;;  %v3381_v38 = vand.u32 2147483647, %v3376_v32  ;;  %v3384_v39 = vmul.f32 0.70710677, %v3378_v33  ;;  %v3386_v40 = vadd.f32 %v830_v34, %v702_v18 }
 0x2a7   : > { %v2440_v41 = vpop.f32.mrf.mxu0  ;;  %v988_v9 = vsub.f32 0.0, %v876_v31  ;;  %vm1035_vm8 = vcmp.ge.f32.partialorder %v3376_v32, 0.0  ;;  %v859_v32 = vmul.f32 0.5, %v3372_v29  ;;  %v1080_v29 = vld [vmem:[#allocation8 + $0x28] sm:$0xff] }
 0x2a8   : > { %v892_v42 = vadd.f32 1.0, %v884_v37  ;;  %v883_v43 = vmul.f32 0.3275911, %v3381_v38  ;;  %v878_v44 = vand.u32 2147483647, %v3384_v39  ;;  %v3394_v50 = vadd.f32 %v2440_v41, %v717_v15 }
 0x2a9   : > { %v3391_v45 = vmul.f32 0.70710677, %v3386_v40  ;;  %v840_v46 = vpop.f32.mrf.mxu0  ;;  %v996_v21 = vmul.f32 %v988_v9, %v876_v31  ;;  %v987_v9 = vsub.f32 0.0, %v3381_v38  ;;  %vm1038_vm1 = vcmp.ge.f32.partialorder %v3384_v39, 0.0 }
 0x2aa   : > { %2605 = vrcp.f32 %v892_v42  ;;  %v891_v47 = vadd.f32 1.0, %v883_v43  ;;  %v886_v12 = vmul.f32 0.3275911, %v878_v44  ;;  %v3396_v51 = vadd.f32 %v840_v46, %v712_v16 }
 0x2ab   : > { %v877_v48 = vand.u32 2147483647, %v3391_v45  ;;  %v2443_v49 = vpop.f32.mrf.mxu0  ;;  %v3399_v54 = vmul.f32 0.70710677, %v3394_v50  ;;  %v990_v25 = vsub.f32 0.0, %v878_v44  ;;  %vm1037_vm6 = vcmp.ge.f32.partialorder %v3391_v45, 0.0 }
 0x2ac   : > { %2607 = vrcp.f32 %v891_v47  ;;  %v894_v52 = vadd.f32 1.0, %v886_v12  ;;  %v3403_v27 = vmul.f32 0.70710677, %v3396_v51  ;;  %v3405_v57 = vadd.f32 %v2443_v49, %v727_v55 }
 0x2ad   : > { %v885_v53 = vmul.f32 0.3275911, %v877_v48  ;;  %v850_v19 = vpop.f32.mrf.mxu0  ;;  %v880_v56 = vand.u32 2147483647, %v3399_v54  ;;  %v989_v37 = vsub.f32 0.0, %v877_v48  ;;  %vm1040_vm2 = vcmp.ge.f32.partialorder %v3399_v54, 0.0 }
 0x2ae   : > { %2609 = vrcp.f32 %v894_v52  ;;  %v3407_v20 = vadd.f32 %v850_v19, %v722_v14  ;;  %v879_v59 = vand.u32 2147483647, %v3403_v27  ;;  %v3411_v60 = vmul.f32 0.70710677, %v3405_v57 }
 0x2af   : > { %v893_v13 = vadd.f32 1.0, %v885_v53  ;;  %v888_v58 = vmul.f32 0.3275911, %v880_v56  ;;  %v992_v22 = vsub.f32 0.0, %v880_v56  ;;  %v1005_v47 = vmul.f32 1.442695, %v996_v21 }
 0x2b0   : > { %v887_v35 = vmul.f32 0.3275911, %v879_v59  ;;  %v882_v28 = vand.u32 2147483647, %v3411_v60  ;;  %v3415_v62 = vmul.f32 0.70710677, %v3407_v20  ;;  %v998_v52 = vmul.f32 %v990_v25, %v878_v44 }
 0x2b1   : > { %2611 = vrcp.f32 %v893_v13  ;;  %v896_v61 = vadd.f32 1.0, %v888_v58  ;;  %v991_v42 = vsub.f32 0.0, %v879_v59  ;;  %v1000_v12 = vmul.f32 %v992_v22, %v880_v56 }
 0x2b2   : > { %v895_v36 = vadd.f32 1.0, %v887_v35  ;;  %v890_v8 = vmul.f32 0.3275911, %v882_v28  ;;  %v881_v10 = vand.u32 2147483647, %v3415_v62  ;;  %v994_v31 = vsub.f32 0.0, %v882_v28 }
 0x2b3   : > { %2613 = vrcp.f32 %v896_v61  ;;  %v997_v19 = vmul.f32 %v989_v37, %v877_v48  ;;  %v999_v61 = vmul.f32 %v991_v42, %v879_v59  ;;  %v1013_v56 = vmul.f32 1.442695, %v1000_v12 }
 0x2b4   : > { %2615 = vrcp.f32 %v895_v36  ;;  %v898_v11 = vadd.f32 1.0, %v890_v8  ;;  %v889_v16 = vmul.f32 0.3275911, %v881_v10  ;;  %v993_v35 = vsub.f32 0.0, %v881_v10 }
 0x2b5   : > { %v1007_v21 = vmul.f32 1.442695, %v997_v19  ;;  %v1011_v25 = vmul.f32 1.442695, %v999_v61  ;;  %v995_v42 = vmul.f32 %v987_v9, %v3381_v38  ;;  %vm1042_vm3 = vcmp.ge.f32.partialorder %v3411_v60, 0.0 }
 0x2b6   : > { %2617 = vrcp.f32 %v898_v11  ;;  %v897_v24 = vadd.f32 1.0, %v889_v16  ;;  %v1002_v16 = vmul.f32 %v994_v31, %v882_v28  ;;  %vm1039_vm4 = vcmp.ge.f32.partialorder %v3403_v27, 0.0 }
 0x2b7   : > { %v3417_v63 = vpop.eup %2605  ;;  %vm1041_vm5 = vcmp.ge.f32.partialorder %v3415_v62, 0.0  ;;  %v865_v54 = vmul.f32 0.5, %v3407_v20  ;;  %v864_v27 = vmul.f32 0.5, %v3394_v50  ;;  %v863_v20 = vmul.f32 0.5, %v3396_v51 }
 0x2b8   : > { %v916_v14 = vmul.f32 1.0614054, %v3417_v63  ;;  %2619 = vrcp.f32 %v897_v24  ;;  %v862_v45 = vmul.f32 0.5, %v3378_v33  ;;  %v860_v51 = vmul.f32 0.5, %v3367_v23  ;;  %v1078_v23 = vld [vmem:[#allocation8 + $0x18] sm:$0xff] }
 0x2b9   : > { %v3421_v15 = vpop.eup %2607  ;;  %2621 = vpow2.f32 %v1005_v47  ;;  %v1017_v47 = vmul.f32 1.442695, %v1002_v16 }
 0x2ba   : > { %v915_v17 = vmul.f32 1.0614054, %v3421_v15  ;;  %v924_v34 = vadd.f32 -1.4531521, %v916_v14  ;;  %v1009_v14 = vmul.f32 1.442695, %v998_v52  ;;  %2623 = vpow2.f32 %v1013_v56 }
 0x2bb   : > { %v3424_v18 = vpop.eup %2609 }
 0x2bc   : > { %v918_v30 = vmul.f32 1.0614054, %v3424_v18  ;;  %v923_v46 = vadd.f32 -1.4531521, %v915_v17  ;;  %v932_v13 = vmul.f32 %v3417_v63, %v924_v34  ;;  %2625 = vpow2.f32 %v1009_v14 }
 0x2bd   : > { %2627 = vpow2.f32 %v1007_v21 }
 0x2be   : > { %v3427_v41 = vpop.eup %2611  ;;  %v926_v43 = vadd.f32 -1.4531521, %v918_v30  ;;  %v931_v8 = vmul.f32 %v3421_v15, %v923_v46  ;;  %v940_v17 = vadd.f32 1.4214138, %v932_v13  ;;  %v1001_v30 = vmul.f32 %v993_v35, %v881_v10 }
 0x2bf   : > { %v917_v49 = vmul.f32 1.0614054, %v3427_v41  ;;  %2629 = vpow2.f32 %v1011_v25 }
 0x2c0   : > { %v934_v53 = vmul.f32 %v3424_v18, %v926_v43  ;;  %v3432_v58 = vpop.eup %2613  ;;  %v939_v37 = vadd.f32 1.4214138, %v931_v8  ;;  %v1015_v38 = vmul.f32 1.442695, %v1001_v30  ;;  %v1003_v8 = vmul.f32 1.442695, %v995_v42 }
 0x2c1   : > { %v925_v55 = vadd.f32 -1.4531521, %v917_v49  ;;  %v920_v11 = vmul.f32 1.0614054, %v3432_v58  ;;  %v3438_v48 = vpop.eup %2615  ;;  %v948_v49 = vmul.f32 %v3417_v63, %v940_v17  ;;  %2631 = vpow2.f32 %v1017_v47 }
 0x2c2   : > { %v942_v36 = vadd.f32 1.4214138, %v934_v53  ;;  %v919_v34 = vmul.f32 1.0614054, %v3438_v48  ;;  %v947_v19 = vmul.f32 %v3421_v15, %v939_v37  ;;  %2633 = vpow2.f32 %v1015_v38 }
 0x2c3   : > { %v933_v44 = vmul.f32 %v3427_v41, %v925_v55  ;;  %v928_v22 = vadd.f32 -1.4531521, %v920_v11  ;;  %v3445_v46 = vpop.eup %2617  ;;  %v956_v56 = vadd.f32 -0.28449672, %v948_v49  ;;  %2635 = vpow2.f32 %v1003_v8 }
 0x2c4   : > { %v950_v59 = vmul.f32 %v3424_v18, %v942_v36  ;;  %v927_v12 = vadd.f32 -1.4531521, %v919_v34  ;;  %v922_v10 = vmul.f32 1.0614054, %v3445_v46  ;;  %v955_v21 = vadd.f32 -0.28449672, %v947_v19 }
 0x2c5   : > { %v941_v24 = vadd.f32 1.4214138, %v933_v44  ;;  %v936_v43 = vmul.f32 %v3432_v58, %v928_v22  ;;  %v3449_v53 = vpop.eup %2619  ;;  %v964_v34 = vmul.f32 %v3417_v63, %v956_v56 }
 0x2c6   : > { %v958_v31 = vadd.f32 -0.28449672, %v950_v59  ;;  %v935_v13 = vmul.f32 %v3438_v48, %v927_v12  ;;  %v930_v55 = vadd.f32 -1.4531521, %v922_v10  ;;  %v921_v61 = vmul.f32 1.0614054, %v3449_v53  ;;  %v2622_v37 = vpop.eup %2621 }
 0x2c7   : > { %v949_v28 = vmul.f32 %v3427_v41, %v941_v24  ;;  %v944_v52 = vadd.f32 1.4214138, %v936_v43  ;;  %v963_v49 = vmul.f32 %v3421_v15, %v955_v21 }
 0x2c8   : > { %v943_v9 = vadd.f32 1.4214138, %v935_v13  ;;  %v938_v11 = vmul.f32 %v3445_v46, %v930_v55  ;;  %v929_v44 = vadd.f32 -1.4531521, %v921_v61  ;;  %v966_v16 = vmul.f32 %v3424_v18, %v958_v31  ;;  %v2624_v13 = vpop.eup %2623 }
 0x2c9   : > { %v952_v35 = vmul.f32 %v3432_v58, %v944_v52  ;;  %v957_v36 = vadd.f32 -0.28449672, %v949_v28  ;;  %v972_v55 = vadd.f32 0.2548296, %v964_v34  ;;  %v2626_v61 = vpop.eup %2625 }
 0x2ca   : > { %v951_v17 = vmul.f32 %v3438_v48, %v943_v9  ;;  %v946_v22 = vadd.f32 1.4214138, %v938_v11  ;;  %v937_v59 = vmul.f32 %v3449_v53, %v929_v44  ;;  %v974_v47 = vadd.f32 0.2548296, %v966_v16  ;;  %v2628_v56 = vpop.eup %2627 }
 0x2cb   : > { %v960_v14 = vadd.f32 -0.28449672, %v952_v35  ;;  %v965_v25 = vmul.f32 %v3427_v41, %v957_v36  ;;  %v971_v44 = vadd.f32 0.2548296, %v963_v49 }
 0x2cc   : > { %v959_v30 = vadd.f32 -0.28449672, %v951_v17  ;;  %v954_v42 = vmul.f32 %v3445_v46, %v946_v22  ;;  %v945_v43 = vadd.f32 1.4214138, %v937_v59  ;;  %v982_v9 = vmul.f32 %v3424_v18, %v974_v47 }
 0x2cd   : > { %v968_v24 = vmul.f32 %v3432_v58, %v960_v14  ;;  %v973_v38 = vadd.f32 0.2548296, %v965_v25  ;;  %v2630_v14 = vpop.eup %2629  ;;  %v980_v22 = vmul.f32 %v3417_v63, %v972_v55  ;;  %v979_v18 = vmul.f32 %v3421_v15, %v971_v44 }
 0x2ce   : > { %v967_v12 = vmul.f32 %v3438_v48, %v959_v30  ;;  %v962_v10 = vadd.f32 -0.28449672, %v954_v42  ;;  %v953_v52 = vmul.f32 %v3449_v53, %v945_v43  ;;  %v2632_v59 = vpop.eup %2631  ;;  %v1022_v34 = vmul.f32 %v2626_v61, %v982_v9 }
 0x2cf   : > { %v976_v28 = vadd.f32 0.2548296, %v968_v24  ;;  %v2634_v42 = vpop.eup %2633 }
 0x2d0   : > { %v975_v19 = vadd.f32 0.2548296, %v967_v12  ;;  %v970_v35 = vmul.f32 %v3445_v46, %v962_v10  ;;  %v961_v36 = vadd.f32 -0.28449672, %v953_v52  ;;  %v1020_v12 = vmul.f32 %v2622_v37, %v980_v22  ;;  %v2636_v49 = vpop.eup %2635 }
 0x2d1   : > { %v984_v31 = vmul.f32 %v3432_v58, %v976_v28  ;;  %v981_v58 = vmul.f32 %v3427_v41, %v973_v38  ;;  %v1030_v63 = vsub.f32 1.0, %v1022_v34 }
 0x2d2   : > { %v983_v11 = vmul.f32 %v3438_v48, %v975_v19  ;;  %v978_v16 = vadd.f32 0.2548296, %v970_v35  ;;  %v969_v17 = vmul.f32 %v3449_v53, %v961_v36  ;;  %v1028_v15 = vsub.f32 1.0, %v1020_v12  ;;  %v1082_v12 = vld [vmem:[#allocation8 + $0x38] sm:$0xff] }
 0x2d3   : > { %v1024_v8 = vmul.f32 %v2624_v13, %v984_v31  ;;  %v1021_v47 = vmul.f32 %v2628_v56, %v981_v58  ;;  %v1019_v31 = vmul.f32 %v2636_v49, %v979_v18  ;;  %v1046_v61 = vsub.f32 0.0, %v1030_v63  ;;  %v1099_v49 = vpop.permute.xlu0 %1098 }
 0x2d4   : > { %v1023_v21 = vmul.f32 %v2630_v14, %v983_v11  ;;  %v986_v24 = vmul.f32 %v3445_v46, %v978_v16  ;;  %v977_v25 = vadd.f32 0.2548296, %v969_v17  ;;  %v866_v35 = vmul.f32 0.5, %v3405_v57 }
 0x2d5   : > { %v1032_v30 = vsub.f32 1.0, %v1024_v8  ;;  %v1029_v19 = vsub.f32 1.0, %v1021_v47  ;;  %v1027_v11 = vsub.f32 1.0, %v1019_v31  ;;  %v1054_v16 = vsel %vm1038_vm1, %v1030_v63, %v1046_v61  ;;  %v1081_v47 = vld [vmem:[#allocation8 + $0x30] sm:$0xff] }
 0x2d6   : > { %v1026_v48 = vmul.f32 %v2632_v59, %v986_v24  ;;  %v985_v43 = vmul.f32 %v3449_v53, %v977_v25  ;;  %v1031_v28 = vsub.f32 1.0, %v1023_v21  ;;  %v1044_v17 = vsub.f32 0.0, %v1028_v15 }
 0x2d7   : > { %v1048_v52 = vsub.f32 0.0, %v1032_v30  ;;  %v1045_v56 = vsub.f32 0.0, %v1029_v19  ;;  %v1043_v21 = vsub.f32 0.0, %v1027_v11  ;;  %v1062_v59 = vadd.f32 1.0, %v1054_v16 }
 0x2d8   : > { %v1034_v41 = vsub.f32 1.0, %v1026_v48  ;;  %v1025_v10 = vmul.f32 %v2634_v42, %v985_v43  ;;  %v1047_v13 = vsub.f32 0.0, %v1031_v28  ;;  %v1052_v39 = vsel %vm1036_vm7, %v1028_v15, %v1044_v17  ;;  %v1076_v43 = vld [vmem:[#allocation8 + $0x8] sm:$0xff] }
 0x2d9   : > { %v1056_v37 = vsel %vm1040_vm2, %v1032_v30, %v1048_v52  ;;  %v1053_v58 = vsel %vm1037_vm6, %v1029_v19, %v1045_v56  ;;  %v1051_v25 = vsel %vm1035_vm8, %v1027_v11, %v1043_v21  ;;  %v861_v30 = vmul.f32 0.5, %v3386_v40  ;;  %v1077_v40 = vld [vmem:[#allocation8 + $0x10] sm:$0xff] }
 0x2da   : > { %v1050_v38 = vsub.f32 0.0, %v1034_v41  ;;  %v1033_v46 = vsub.f32 1.0, %v1025_v10  ;;  %v1055_v9 = vsel %vm1039_vm4, %v1031_v28, %v1047_v13  ;;  %v1064_v14 = vadd.f32 1.0, %v1056_v37  ;;  %v1079_v28 = vld [vmem:[#allocation8 + $0x20] sm:$0xff]  ;;  %v1109_v10 = vpop.permute.xlu0 %1108  ;;  %v1412_v21 = vld [vmem:[#allocation11 + $0xd0] sm:$0xff] }
 0x2db   : > { %v1063_v62 = vadd.f32 1.0, %v1055_v9  ;;  %v1061_v24 = vadd.f32 1.0, %v1053_v58  ;;  %v1070_v26 = vmul.f32 %v1062_v59, %v862_v45  ;;  %v1060_v34 = vadd.f32 1.0, %v1052_v39  ;;  %v1413_v58 = vld [vmem:[#allocation11 + $0xd8] sm:$0xff] }
 0x2dc   : > { %v1058_v53 = vsel %vm1042_vm3, %v1034_v41, %v1050_v38  ;;  %v1049_v55 = vsub.f32 0.0, %v1033_v46  ;;  %v1072_v22 = vmul.f32 %v1064_v14, %v864_v27  ;;  %v1059_v42 = vadd.f32 1.0, %v1051_v25  ;;  %v1094_v41 = vpop.permute.xlu1 %1093 }
 0x2dd   : > { %v1066_v36 = vadd.f32 1.0, %v1058_v53  ;;  %v1071_v50 = vmul.f32 %v1063_v62, %v863_v20  ;;  %v1069_v18 = vmul.f32 %v1061_v24, %v861_v30  ;;  %v1068_v33 = vmul.f32 %v1060_v34, %v860_v51  ;;  %v1414_v62 = vld [vmem:[#allocation11 + $0xe0] sm:$0xff] }
 0x2de   : > { %v1057_v8 = vsel %vm1041_vm5, %v1033_v46, %v1049_v55  ;;  %v1067_v48 = vmul.f32 %v1059_v42, %v859_v32  ;;  %v1119_v55 = vpop.permute.xlu0 %1118 }
 0x2df   : > { %v1074_v44 = vmul.f32 %v1066_v36, %v866_v35  ;;  %v1065_v60 = vadd.f32 1.0, %v1057_v8 }
 0x2e0   : > { %v1104_v31 = vpop.permute.xlu1 %1103 }
 0x2e1   : > { %2444 = vmatprep.subr.mxu1 %v1074_v44  ;;  %v1073_v57 = vmul.f32 %v1065_v60, %v865_v54 }
 0x2e2   : > { %2445 = vmatpush3.msra.mxu1 %v1074_v44  ;;  %v1129_v11 = vpop.permute.xlu0 %1128 }
 0x2e3   : > { %2446 = vmatprep.subr.mxu1 %v1073_v57 }
 0x2e4   : > { %2447 = vmatpush3.msra.mxu1 %v1073_v57  ;;  %v1114_v35 = vpop.permute.xlu1 %1113  ;;  %v1415_v57 = vld [vmem:[#allocation11 + $0xe8] sm:$0xff] }
 0x2e5   : > { %2448 = vmatprep.subr.mxu1 %v1072_v22 }
 0x2e6   : > { %2449 = vmatpush3.msra.mxu1 %v1072_v22 }
 0x2e7   : > { %2450 = vmatprep.subr.mxu1 %v1071_v50 }
 0x2e8   : > { %2451 = vmatpush3.msra.mxu1 %v1071_v50  ;;  %v1124_v14 = vpop.permute.xlu1 %1123 }
 0x2e9   : > { %2452 = vmatprep.subr.mxu1 %v1070_v26 }
 0x2ea   : > { %2453 = vmatpush3.msra.mxu1 %v1070_v26 }
 0x2eb   : > { %2454 = vmatprep.subr.mxu1 %v1069_v18 }
 0x2ec   : > { %2455 = vmatpush3.msra.mxu1 %v1069_v18 }
 0x2ed   : > { %2456 = vmatprep.subr.mxu1 %v1068_v33 }
 0x2ee   : > { %2457 = vmatpush3.msra.mxu1 %v1068_v33 }
 0x2ef   : > { %2458 = vmatprep.subr.mxu1 %v1067_v48 }
 0x2f0   : > { %2459 = vmatpush3.msra.mxu1 %v1067_v48 }
 0x2f1   : > { %2461 = vmatmul.mubr.msk.f32.vlgmr.msra.gmra.mxu1 %vm729_vm0, %v1076_v43 }
 0x2f2   : > { %2463 = vmatprep.mubr.msk.f32.mxu1 %vm729_vm0, %v1077_v40 }
 0x2f5   : > { %2464 = vmatmul.mubr.msk.f32.gmra.mxu1 %vm729_vm0, %v1078_v23 }
 0x2f6   : > { %2466 = vmatprep.mubr.msk.f32.mxu1 %vm729_vm0, %v1079_v28 }
 0x2f9   : > { %2467 = vmatmul.mubr.msk.f32.gmra.mxu1 %vm729_vm0, %v1080_v29 }
 0x2fa   : > { %2469 = vmatprep.mubr.msk.f32.mxu1 %vm729_vm0, %v1081_v47 }
 0x2fd   : > { %2470 = vmatmul.mubr.msk.f32.gmra.mxu1 %vm729_vm0, %v1082_v12 }
 0x3b1   : > { %v2462_v52 = vpop.f32.mrf.mxu1 }
 0x3b2   : > { %v1227_v63 = vadd.f32 %v2462_v52, %v1099_v49 }
 0x3b3   : > { %v1221_v38 = vpop.f32.mrf.mxu1 }
 0x3b4   : > { %v3502_v46 = vadd.f32 %v1227_v63, %v3298_v6  ;;  %v1222_v13 = vadd.f32 %v1221_v38, %v1094_v41  ;;  %v1409_v38 = vld [vmem:[#allocation11 + $0xb8] sm:$0xff] }
 0x3b5   : > { %v2465_v19 = vpop.f32.mrf.mxu1 }
 0x3b6   : > { %4103 = vst [vmem:[#allocation23_spill] sm:$0xff] %v3502_v46  ;;  %v3505_v15 = vadd.f32 %v1222_v13, %v3300_v7  ;;  %v1237_v53 = vadd.f32 %v2465_v19, %v1109_v10  ;;  %1270 = vadd.xlane.f32.xlu0 %v3502_v46  ;;  %v1411_v10 = vld [vmem:[#allocation11 + $0xc8] sm:$0xff] }
 0x3b7   : > { %v1231_v37 = vpop.f32.mrf.mxu1 }
 0x3b8   : > { %4104 = vst [vmem:[#allocation24_spill] sm:$0xff] %v3505_v15  ;;  %v1232_v61 = vadd.f32 %v1231_v37, %v1104_v31  ;;  %1268 = vadd.xlane.f32.xlu1 %v3505_v15  ;;  %v3510_v8 = vadd.f32 %v1237_v53, %v3292_v4  ;;  %v1410_v31 = vld [vmem:[#allocation11 + $0xc0] sm:$0xff]  ;;  %v1408_v53 = vld [vmem:[#allocation11 + $0xb0] sm:$0xff] }
 0x3b9   : > { %v2468_v36 = vpop.f32.mrf.mxu1  ;;  %v1406_v37 = vld [vmem:[#allocation11 + $0xa0] sm:$0xff] }
 0x3ba   : > { %4105 = vst [vmem:[#allocation25_spill] sm:$0xff] %v3510_v8  ;;  %v3513_v6 = vadd.f32 %v1232_v61, %v3294_v5  ;;  %v1247_v9 = vadd.f32 %v2468_v36, %v1119_v55  ;;  %v1407_v55 = vld [vmem:[#allocation11 + $0xa8] sm:$0xff]  ;;  %v1405_v61 = vld [vmem:[#allocation11 + $0x98] sm:$0xff] }
 0x3bb   : > { %v1241_v56 = vpop.f32.mrf.mxu1  ;;  %v1403_v36 = vld [vmem:[#allocation11 + $0x88] sm:$0xff] }
 0x3bc   : > { %4106 = vst [vmem:[#allocation26_spill] sm:$0xff] %v3513_v6  ;;  %v1242_v7 = vadd.f32 %v1241_v56, %v1114_v35  ;;  %1274 = vadd.xlane.f32.xlu1 %v3510_v8  ;;  %1272 = vadd.xlane.f32.xlu0 %v3513_v6  ;;  %v3518_v44 = vadd.f32 %v1247_v9, %v3282_v1  ;;  %v1417_v1 = vld [vmem:[#allocation11 + $0xf8] sm:$0xff]  ;;  %v1404_v35 = vld [vmem:[#allocation11 + $0x90] sm:$0xff]  ;;  %v1402_v9 = vld [vmem:[#allocation11 + $0x80] sm:$0xff] }
 0x3bd   : > { %v2471_v54 = vpop.f32.mrf.mxu1  ;;  %1430 = vmatprep.subr.mxu0 %v1417_v1  ;;  %v1401_v56 = vld [vmem:[#allocation11 + $0x78] sm:$0xff] }
 0x3be   : > { %4107 = vst [vmem:[#allocation27_spill] sm:$0xff] %v3518_v44  ;;  %v3521_v60 = vadd.f32 %v1242_v7, %v3288_v3  ;;  %v1257_v4 = vadd.f32 %v2471_v54, %v1129_v11  ;;  %v1416_v3 = vld [vmem:[#allocation11 + $0xf0] sm:$0xff]  ;;  %v1399_v11 = vld [vmem:[#allocation11 + $0x68] sm:$0xff]  ;;  %v1398_v54 = vld [vmem:[#allocation11 + $0x60] sm:$0xff] }
 0x3bf   : > { %v1251_v16 = vpop.f32.mrf.mxu1  ;;  %1431 = vmatpush1.msra.mxu0 %v1416_v3  ;;  %v1400_v7 = vld [vmem:[#allocation11 + $0x70] sm:$0xff]  ;;  %v1393_v1 = vld [vmem:[#allocation11 + $0x38] sm:$0xff] }
 0x3c0   : > { %4108 = vst [vmem:[#allocation28_spill] sm:$0xff] %v3521_v60  ;;  %v1252_v5 = vadd.f32 %v1251_v16, %v1124_v14  ;;  %1278 = vadd.xlane.f32.xlu1 %v3518_v44  ;;  %1276 = vadd.xlane.f32.xlu0 %v3521_v60  ;;  %v3526_v17 = vadd.f32 %v1257_v4, %v3280_v0  ;;  %v1397_v4 = vld [vmem:[#allocation11 + $0x58] sm:$0xff]  ;;  %v1396_v14 = vld [vmem:[#allocation11 + $0x50] sm:$0xff]  ;;  %v1395_v16 = vld [vmem:[#allocation11 + $0x48] sm:$0xff] }
 0x3c1   : > { %1432 = vmatprep.subr.mxu0 %v1415_v57  ;;  %v1392_v3 = vld [vmem:[#allocation11 + $0x30] sm:$0xff]  ;;  %v1391_v57 = vld [vmem:[#allocation11 + $0x28] sm:$0xff] }
 0x3c2   : > { %4109 = vst [vmem:[#allocation29_spill] sm:$0xff] %v3526_v17  ;;  %v3529_v27 = vadd.f32 %v1252_v5, %v3286_v2  ;;  %1433 = vmatpush1.msra.mxu0 %v1414_v62  ;;  %v1394_v5 = vld [vmem:[#allocation11 + $0x40] sm:$0xff] }
 0x3c3   : > { %1434 = vmatprep.subr.mxu0 %v1413_v58  ;;  %v1390_v62 = vld [vmem:[#allocation11 + $0x20] sm:$0xff]  ;;  %v1389_v58 = vld [vmem:[#allocation11 + $0x18] sm:$0xff] }
 0x3c4   : > { %4110 = vst [vmem:[#allocation30_spill] sm:$0xff] %v3529_v27  ;;  %1282 = vadd.xlane.f32.xlu1 %v3526_v17  ;;  %1280 = vadd.xlane.f32.xlu0 %v3529_v27 }
 0x3c5   : > { %1435 = vmatpush1.msra.mxu0 %v1412_v21  ;;  %v2991_v21 = vmov 0.0  }
 0x3c6   : > { %1436 = vmatprep.subr.mxu0 %v1411_v10  ;;  %1494 = vmatprep.mubr.f32.mxu0 %v2991_v21 }
 0x3c7   : > { %1437 = vmatpush1.msra.mxu0 %v1410_v31 }
 0x3c8   : > { %1438 = vmatprep.subr.mxu0 %v1409_v38 }
 0x3c9   : > { %1439 = vmatpush1.msra.mxu0 %v1408_v53 }
 0x3ca   : > { %1440 = vmatprep.subr.mxu0 %v1407_v55 }
 0x3cb   : > { %1441 = vmatpush1.msra.mxu0 %v1406_v37 }
 0x3cc   : > { %1442 = vmatprep.subr.mxu0 %v1405_v61  ;;  %v2318_v61 = vld [vmem:[%s4030_s3] ss:$0 sm:$0xff] }
 0x3cd   : > { %1443 = vmatpush1.msra.mxu0 %v1404_v35 }
 0x3ce   : > { %1444 = vmatprep.subr.mxu0 %v1403_v36 }
 0x3cf   : > { %1445 = vmatpush1.msra.mxu0 %v1402_v9 }
 0x3d0   : > { %1446 = vmatprep.subr.mxu0 %v1401_v56  ;;  %v2319_v56 = vld [vmem:[%s4031_s4] ss:$0 sm:$0xff] }
 0x3d1   : > { %1447 = vmatpush1.msra.mxu0 %v1400_v7 }
 0x3d2   : > { %1448 = vmatprep.subr.mxu0 %v1399_v11 }
 0x3d3   : > { %1449 = vmatpush1.msra.mxu0 %v1398_v54 }
 0x3d4   : > { %1450 = vmatprep.subr.mxu0 %v1397_v4 }
 0x3d5   : > { %1451 = vmatpush1.msra.mxu0 %v1396_v14 }
 0x3d6   : > { %1452 = vmatprep.subr.mxu0 %v1395_v16 }
 0x3d7   : > { %1453 = vmatpush1.msra.mxu0 %v1394_v5 }
 0x3d8   : > { %1454 = vmatprep.subr.mxu0 %v1393_v1 }
 0x3d9   : > { %1455 = vmatpush1.msra.mxu0 %v1392_v3 }
 0x3da   : > { %1456 = vmatprep.subr.mxu0 %v1391_v57 }
 0x3db   : > { %1457 = vmatpush1.msra.mxu0 %v1390_v62 }
 0x3dc   : > { %1458 = vmatprep.subr.mxu0 %v1389_v58 }
 0x43f   : > { %v1271_v0 = vpop.xlane.xlu0 %1270 }
 0x440   : > { %v1285_v20 = vmul.f32 0.0078125, %v1271_v0  ;;  %v1388_v0 = vld [vmem:[#allocation11 + $0x10] sm:$0xff] }
 0x441   : > { %v1269_v2 = vpop.xlane.xlu1 %1268  ;;  %1459 = vmatpush1.msra.mxu0 %v1388_v0 }
 0x442   : > { %v3534_v22 = vsub.f32 %v3502_v46, %v1285_v20  ;;  %v1284_v59 = vmul.f32 0.0078125, %v1269_v2  ;;  %v1387_v20 = vld [vmem:[#allocation11 + $0x8] sm:$0xff]  ;;  %v1386_v2 = vld [vmem:[#allocation11] sm:$0xff] }
 0x443   : > { %1460 = vmatprep.subr.mxu0 %v1387_v20 }
 0x444   : > { %v3537_v39 = vsub.f32 %v3505_v15, %v1284_v59  ;;  %v1301_v45 = vmul.f32 %v3534_v22, %v3534_v22  ;;  %1461 = vmatpush1.msra.mxu0 %v1386_v2 }
 0x445   : > { %v1273_v50 = vpop.xlane.xlu0 %1272  ;;  %v1275_v24 = vpop.xlane.xlu1 %1274 }
 0x446   : > { %v1286_v25 = vmul.f32 0.0078125, %v1273_v50  ;;  %v1287_v30 = vmul.f32 0.0078125, %v1275_v24  ;;  %1310 = vadd.xlane.f32.xlu1 %v1301_v45  ;;  %v1300_v26 = vmul.f32 %v3537_v39, %v3537_v39 }
 0x448   : > { %v3544_v34 = vsub.f32 %v3513_v6, %v1286_v25  ;;  %v3547_v51 = vsub.f32 %v3510_v8, %v1287_v30  ;;  %1308 = vadd.xlane.f32.xlu0 %v1300_v26 }
 0x449   : > { %v1277_v18 = vpop.xlane.xlu0 %1276  ;;  %v1279_v42 = vpop.xlane.xlu1 %1278 }
 0x44a   : > { %v1288_v32 = vmul.f32 0.0078125, %v1277_v18  ;;  %v1289_v33 = vmul.f32 0.0078125, %v1279_v42  ;;  %v1302_v48 = vmul.f32 %v3544_v34, %v3544_v34  ;;  %v1303_v43 = vmul.f32 %v3547_v51, %v3547_v51 }
 0x44c   : > { %v3554_v40 = vsub.f32 %v3521_v60, %v1288_v32  ;;  %v3557_v23 = vsub.f32 %v3518_v44, %v1289_v33  ;;  %1312 = vadd.xlane.f32.xlu0 %v1302_v48  ;;  %1314 = vadd.xlane.f32.xlu1 %v1303_v43 }
 0x44d   : > { %v1281_v28 = vpop.xlane.xlu0 %1280  ;;  %v1283_v29 = vpop.xlane.xlu1 %1282 }
 0x44e   : > { %v1290_v47 = vmul.f32 0.0078125, %v1281_v28  ;;  %v1291_v12 = vmul.f32 0.0078125, %v1283_v29  ;;  %v1304_v49 = vmul.f32 %v3554_v40, %v3554_v40  ;;  %v1305_v41 = vmul.f32 %v3557_v23, %v3557_v23 }
 0x450   : > { %v3564_v52 = vsub.f32 %v3529_v27, %v1290_v47  ;;  %v3567_v63 = vsub.f32 %v3526_v17, %v1291_v12  ;;  %1316 = vadd.xlane.f32.xlu0 %v1304_v49  ;;  %1318 = vadd.xlane.f32.xlu1 %v1305_v41 }
 0x452   : > { %v1306_v13 = vmul.f32 %v3564_v52, %v3564_v52  ;;  %v1307_v19 = vmul.f32 %v3567_v63, %v3567_v63 }
 0x454   : > { %1320 = vadd.xlane.f32.xlu0 %v1306_v13  ;;  %1322 = vadd.xlane.f32.xlu1 %v1307_v19 }
 0x4cf   : > { %v1311_v59 = vpop.xlane.xlu1 %1310 }
 0x4d0   : > { %v1325_v45 = vmul.f32 0.0078125, %v1311_v59 }
 0x4d1   : > { %v1309_v50 = vpop.xlane.xlu0 %1308 }
 0x4d2   : > { %v1333_v24 = vadd.f32 1e-05, %v1325_v45  ;;  %v1324_v25 = vmul.f32 0.0078125, %v1309_v50 }
 0x4d4   : > { %2637 = vrsqrt.f32 %v1333_v24  ;;  %v1332_v30 = vadd.f32 1e-05, %v1324_v25 }
 0x4d5   : > { %v1313_v26 = vpop.xlane.xlu0 %1312  ;;  %v1315_v18 = vpop.xlane.xlu1 %1314 }
 0x4d6   : > { %2639 = vrsqrt.f32 %v1332_v30  ;;  %v1326_v42 = vmul.f32 0.0078125, %v1313_v26  ;;  %v1327_v32 = vmul.f32 0.0078125, %v1315_v18  ;;  %v2006_v30 = vld [vmem:[#allocation13 + $0xf8] sm:$0xff]  ;;  %v2005_v26 = vld [vmem:[#allocation13 + $0xf0] sm:$0xff] }
 0x4d7   : > { %2360 = vmatprep.subr.mxu1 %v2006_v30  ;;  %v1989_v18 = vld [vmem:[#allocation13 + $0x70] sm:$0xff] }
 0x4d8   : > { %v1334_v33 = vadd.f32 1e-05, %v1326_v42  ;;  %v1335_v48 = vadd.f32 1e-05, %v1327_v32  ;;  %v2004_v42 = vld [vmem:[#allocation13 + $0xe8] sm:$0xff]  ;;  %v2003_v32 = vld [vmem:[#allocation13 + $0xe0] sm:$0xff] }
 0x4d9   : > { %v1317_v43 = vpop.xlane.xlu0 %1316  ;;  %v1319_v28 = vpop.xlane.xlu1 %1318 }
 0x4da   : > { %2641 = vrsqrt.f32 %v1334_v33  ;;  %v1328_v29 = vmul.f32 0.0078125, %v1317_v43  ;;  %v1329_v12 = vmul.f32 0.0078125, %v1319_v28  ;;  %v1987_v33 = vld [vmem:[#allocation13 + $0x60] sm:$0xff]  ;;  %v2001_v43 = vld [vmem:[#allocation13 + $0xd0] sm:$0xff] }
 0x4db   : > { %2643 = vrsqrt.f32 %v1335_v48  ;;  %v2002_v48 = vld [vmem:[#allocation13 + $0xd8] sm:$0xff]  ;;  %v1985_v28 = vld [vmem:[#allocation13 + $0x50] sm:$0xff] }
 0x4dc   : > { %v1336_v47 = vadd.f32 1e-05, %v1328_v29  ;;  %v1337_v41 = vadd.f32 1e-05, %v1329_v12  ;;  %v2000_v29 = vld [vmem:[#allocation13 + $0xc8] sm:$0xff]  ;;  %v1999_v12 = vld [vmem:[#allocation13 + $0xc0] sm:$0xff] }
 0x4dd   : > { %v1321_v49 = vpop.xlane.xlu0 %1320  ;;  %v1323_v31 = vpop.xlane.xlu1 %1322 }
 0x4de   : > { %2645 = vrsqrt.f32 %v1336_v47  ;;  %v1330_v10 = vmul.f32 0.0078125, %v1321_v49  ;;  %v1331_v19 = vmul.f32 0.0078125, %v1323_v31  ;;  %v1984_v47 = vld [vmem:[#allocation13 + $0x48] sm:$0xff]  ;;  %v1983_v49 = vld [vmem:[#allocation13 + $0x40] sm:$0xff]  ;;  %v1997_v31 = vld [vmem:[#allocation13 + $0xb0] sm:$0xff] }
 0x4df   : > { %2647 = vrsqrt.f32 %v1337_v41  ;;  %v1998_v41 = vld [vmem:[#allocation13 + $0xb8] sm:$0xff] }
 0x4e0   : > { %v1338_v55 = vadd.f32 1e-05, %v1330_v10  ;;  %v1339_v9 = vadd.f32 1e-05, %v1331_v19  ;;  %v1982_v10 = vld [vmem:[#allocation13 + $0x38] sm:$0xff]  ;;  %v1980_v19 = vld [vmem:[#allocation13 + $0x28] sm:$0xff] }
 0x4e1   : > { %v2638_v38 = vpop.eup %2637 }
 0x4e2   : > { %v1349_v37 = vmul.f32 %v2638_v38, %v3534_v22  ;;  %2649 = vrsqrt.f32 %v1338_v55  ;;  %v1981_v38 = vld [vmem:[#allocation13 + $0x30] sm:$0xff]  ;;  %v1979_v55 = vld [vmem:[#allocation13 + $0x20] sm:$0xff] }
 0x4e3   : > { %v2640_v13 = vpop.eup %2639  ;;  %2651 = vrsqrt.f32 %v1339_v9  ;;  %v1992_v9 = vld [vmem:[#allocation13 + $0x88] sm:$0xff] }
 0x4e4   : > { %v1348_v53 = vmul.f32 %v2640_v13, %v3537_v39  ;;  %v1364_v11 = vmul.f32 %v2318_v61, %v1349_v37  ;;  %v1996_v13 = vld [vmem:[#allocation13 + $0xa8] sm:$0xff]  ;;  %v1994_v37 = vld [vmem:[#allocation13 + $0x98] sm:$0xff] }
 0x4e6   : > { %v1363_v35 = vmul.f32 %v2318_v61, %v1348_v53  ;;  %v1379_v22 = vadd.f32 %v2319_v56, %v1364_v11  ;;  %v1995_v53 = vld [vmem:[#allocation13 + $0xa0] sm:$0xff] }
 0x4e7   : > { %v2642_v36 = vpop.eup %2641  ;;  %v1975_v11 = vld [vmem:[#allocation13] sm:$0xff] }
 0x4e8   : > { %v1378_v7 = vadd.f32 %v2319_v56, %v1363_v35  ;;  %v1350_v39 = vmul.f32 %v2642_v36, %v3544_v34  ;;  %v2644_v54 = vpop.eup %2643  ;;  %v1993_v35 = vld [vmem:[#allocation13 + $0x90] sm:$0xff] }
 0x4e9   : > { %v1351_v14 = vmul.f32 %v2644_v54, %v3547_v51  ;;  %v1977_v36 = vld [vmem:[#allocation13 + $0x10] sm:$0xff] }
 0x4ea   : > { %1495 = vmatmul.mubr.f32.vlgmr.msra.gmra.mxu0 %v1378_v7  ;;  %v1365_v4 = vmul.f32 %v2318_v61, %v1350_v39  ;;  %v1991_v7 = vld [vmem:[#allocation13 + $0x80] sm:$0xff]  ;;  %v1420_v39 = vlaneseq }
 0x4eb   : > { %1500 = vmatprep.mubr.f32.mxu0 %v2991_v21  ;;  %v2646_v16 = vpop.eup %2645  ;;  %v1366_v1 = vmul.f32 %v2318_v61, %v1351_v14 }
 0x4ec   : > { %v1380_v5 = vadd.f32 %v2319_v56, %v1365_v4  ;;  %v1352_v3 = vmul.f32 %v2646_v16, %v3554_v40  ;;  %v2648_v57 = vpop.eup %2647  ;;  %v1421_v54 = vshrl.u32 %v1420_v39, 7  ;;  %v1418_v4 = vld [vmem:[%s4037_s10] sm:$0x3] }
 0x4ed   : > { %v1381_v34 = vadd.f32 %v2319_v56, %v1366_v1  ;;  %v1353_v58 = vmul.f32 %v2648_v57, %v3557_v23 }
 0x4ee   : > { %1501 = vmatmul.mubr.f32.gmra.mxu0 %v1379_v22  ;;  %v1367_v62 = vmul.f32 %v2318_v61, %v1352_v3  ;;  %v1422_v22 = vsub.s32 0, %v1421_v54  ;;  %v1426_v14 = vsub.s32 1, %v1421_v54 }
 0x4ef   : > { %1506 = vmatprep.mubr.f32.mxu0 %v2991_v21  ;;  %v2650_v0 = vpop.eup %2649  ;;  %v1368_v20 = vmul.f32 %v2318_v61, %v1353_v58 }
 0x4f0   : > { %v1382_v51 = vadd.f32 %v2319_v56, %v1367_v62  ;;  %v1354_v2 = vmul.f32 %v2650_v0, %v3564_v52  ;;  %v2652_v59 = vpop.eup %2651  ;;  %v1990_v52 = vld [vmem:[#allocation13 + $0x78] sm:$0xff]  ;;  %v3598_v16 = vrot.slane %v1418_v4, %v1422_v22 }
 0x4f1   : > { %v1383_v40 = vadd.f32 %v2319_v56, %v1368_v20  ;;  %v1355_v50 = vmul.f32 %v2652_v59, %v3567_v63  ;;  %2361 = vmatpush3.msra.mxu1 %v1990_v52  ;;  %v1988_v63 = vld [vmem:[#allocation13 + $0x68] sm:$0xff] }
 0x4f2   : > { %1507 = vmatmul.mubr.f32.gmra.mxu0 %v1380_v5  ;;  %v1369_v45 = vmul.f32 %v2318_v61, %v1354_v2  ;;  %2362 = vmatprep.subr.mxu1 %v2005_v26  ;;  %v3600_v5 = vrot.slane %v1418_v4, %v1426_v14 }
 0x4f3   : > { %1512 = vmatprep.mubr.f32.mxu0 %v2991_v21  ;;  %v1370_v24 = vmul.f32 %v2318_v61, %v1355_v50  ;;  %2363 = vmatpush3.msra.mxu1 %v1989_v18  ;;  %v1978_v61 = vld [vmem:[#allocation13 + $0x18] sm:$0xff] }
 0x4f4   : > { %v1384_v23 = vadd.f32 %v2319_v56, %v1369_v45  ;;  %2364 = vmatprep.subr.mxu1 %v2004_v42 }
 0x4f5   : > { %v1385_v25 = vadd.f32 %v2319_v56, %v1370_v24  ;;  %2365 = vmatpush3.msra.mxu1 %v1988_v63  ;;  %v1976_v56 = vld [vmem:[#allocation13 + $0x8] sm:$0xff] }
 0x4f6   : > { %1513 = vmatmul.mubr.f32.gmra.mxu0 %v1381_v34  ;;  %2366 = vmatprep.subr.mxu1 %v2003_v32 }
 0x4f7   : > { %1518 = vmatprep.mubr.f32.mxu0 %v2991_v21  ;;  %2367 = vmatpush3.msra.mxu1 %v1987_v33 }
 0x4f8   : > { %2368 = vmatprep.subr.mxu1 %v2002_v48 }
 0x4fa   : > { %1519 = vmatmul.mubr.f32.gmra.mxu0 %v1382_v51 }
 0x4fb   : > { %1524 = vmatprep.mubr.f32.mxu0 %v2991_v21 }
 0x4fe   : > { %1525 = vmatmul.mubr.f32.gmra.mxu0 %v1383_v40 }
 0x4ff   : > { %1530 = vmatprep.mubr.f32.mxu0 %v2991_v21 }
 0x502   : > { %1531 = vmatmul.mubr.f32.gmra.mxu0 %v1384_v23 }
 0x503   : > { %1536 = vmatprep.mubr.f32.mxu0 %v2991_v21  ;;  %v1986_v21 = vld [vmem:[#allocation13 + $0x58] sm:$0xff] }
 0x504   : > { %2369 = vmatpush3.msra.mxu1 %v1986_v21 }
 0x505   : > { %2370 = vmatprep.subr.mxu1 %v2001_v43 }
 0x506   : > { %1537 = vmatmul.mubr.f32.gmra.mxu0 %v1385_v25  ;;  %2371 = vmatpush3.msra.mxu1 %v1985_v28 }
 0x507   : > { %2372 = vmatprep.subr.mxu1 %v2000_v29 }
 0x508   : > { %2373 = vmatpush3.msra.mxu1 %v1984_v47 }
 0x509   : > { %2374 = vmatprep.subr.mxu1 %v1999_v12 }
 0x50a   : > { %2375 = vmatpush3.msra.mxu1 %v1983_v49 }
 0x50b   : > { %2376 = vmatprep.subr.mxu1 %v1998_v41 }
 0x50c   : > { %2377 = vmatpush3.msra.mxu1 %v1982_v10 }
 0x50d   : > { %2378 = vmatprep.subr.mxu1 %v1997_v31 }
 0x50e   : > { %2379 = vmatpush3.msra.mxu1 %v1981_v38 }
 0x50f   : > { %2380 = vmatprep.subr.mxu1 %v1996_v13 }
 0x510   : > { %2381 = vmatpush3.msra.mxu1 %v1980_v19 }
 0x511   : > { %2382 = vmatprep.subr.mxu1 %v1995_v53 }
 0x512   : > { %2383 = vmatpush3.msra.mxu1 %v1979_v55 }
 0x513   : > { %2384 = vmatprep.subr.mxu1 %v1994_v37 }
 0x514   : > { %2385 = vmatpush3.msra.mxu1 %v1978_v61 }
 0x515   : > { %2386 = vmatprep.subr.mxu1 %v1993_v35 }
 0x516   : > { %2387 = vmatpush3.msra.mxu1 %v1977_v36 }
 0x517   : > { %2388 = vmatprep.subr.mxu1 %v1992_v9 }
 0x518   : > { %2389 = vmatpush3.msra.mxu1 %v1976_v56 }
 0x519   : > { %2390 = vmatprep.subr.mxu1 %v1991_v7 }
 0x51a   : > { %2391 = vmatpush3.msra.mxu1 %v1975_v11 }
 0x5aa   : > { %v1496_v1 = vpop.f32.mrf.mxu0 }
 0x5ab   : > { %v1497_v3 = vadd.f32 %v1496_v1, %v3598_v16 }
 0x5ac   : > { %v1498_v57 = vpop.f32.mrf.mxu0 }
 0x5ad   : > { %v3603_v34 = vmul.f32 0.70710677, %v1497_v3  ;;  %v3606_v62 = vadd.f32 %v1498_v57, %v3600_v5  ;;  %v3656_v57 = vmul.f32 0.5, %v1497_v3 }
 0x5ae   : > { %v1502_v58 = vpop.f32.mrf.mxu0 }
 0x5af   : > { %v1575_v0 = vand.u32 2147483647, %v3603_v34  ;;  %v3610_v51 = vmul.f32 0.70710677, %v3606_v62  ;;  %v3613_v20 = vadd.f32 %v1502_v58, %v3598_v16  ;;  %vm1895_vm9 = vcmp.ge.f32.partialorder %v3603_v34, 0.0 }
 0x5b0   : > { %v1504_v2 = vpop.f32.mrf.mxu0 }
 0x5b1   : > { %v1591_v59 = vmul.f32 0.3275911, %v1575_v0  ;;  %v1576_v40 = vand.u32 2147483647, %v3610_v51  ;;  %v3617_v45 = vmul.f32 0.70710677, %v3613_v20  ;;  %v3620_v50 = vadd.f32 %v1504_v2, %v3600_v5 }
 0x5b2   : > { %v1508_v23 = vpop.f32.mrf.mxu0  ;;  %v1799_v25 = vsub.f32 0.0, %v1575_v0  ;;  %vm1896_vm10 = vcmp.ge.f32.partialorder %v3610_v51, 0.0 }
 0x5b3   : > { %v1607_v24 = vadd.f32 1.0, %v1591_v59  ;;  %v1577_v30 = vand.u32 2147483647, %v3617_v45  ;;  %v3624_v52 = vmul.f32 0.70710677, %v3620_v50  ;;  %v1800_v18 = vsub.f32 0.0, %v1576_v40 }
 0x5b4   : > { %v1510_v26 = vpop.f32.mrf.mxu0  ;;  %v3628_v32 = vadd.f32 %v1508_v23, %v3598_v16  ;;  %v1815_v48 = vmul.f32 %v1799_v25, %v1575_v0  ;;  %v1592_v28 = vmul.f32 0.3275911, %v1576_v40  ;;  %vm1897_vm12 = vcmp.ge.f32.partialorder %v3617_v45, 0.0 }
 0x5b5   : > { %2653 = vrcp.f32 %v1607_v24  ;;  %v1578_v63 = vand.u32 2147483647, %v3624_v52  ;;  %v3631_v33 = vadd.f32 %v1510_v26, %v3600_v5  ;;  %v1801_v21 = vsub.f32 0.0, %v1577_v30 }
 0x5b6   : > { %v1514_v42 = vpop.f32.mrf.mxu0  ;;  %v3634_v29 = vmul.f32 0.70710677, %v3628_v32  ;;  %v1816_v47 = vmul.f32 %v1800_v18, %v1576_v40  ;;  %v1593_v49 = vmul.f32 0.3275911, %v1577_v30  ;;  %v1831_v31 = vmul.f32 1.442695, %v1815_v48 }
 0x5b7   : > { %v1802_v41 = vsub.f32 0.0, %v1578_v63  ;;  %v3637_v10 = vmul.f32 0.70710677, %v3631_v33  ;;  %v1817_v38 = vmul.f32 %v1801_v21, %v1577_v30  ;;  %v3641_v19 = vadd.f32 %v1514_v42, %v3598_v16 }
 0x5b8   : > { %v1516_v43 = vpop.f32.mrf.mxu0  ;;  %v1579_v13 = vand.u32 2147483647, %v3634_v29  ;;  %v1608_v53 = vadd.f32 1.0, %v1592_v28  ;;  %v1594_v55 = vmul.f32 0.3275911, %v1578_v63  ;;  %v1609_v56 = vadd.f32 1.0, %v1593_v49 }
 0x5b9   : > { %v3644_v37 = vadd.f32 %v1516_v43, %v3600_v5  ;;  %v1833_v61 = vmul.f32 1.442695, %v1816_v47  ;;  %v1580_v35 = vand.u32 2147483647, %v3637_v10  ;;  %v3648_v36 = vmul.f32 0.70710677, %v3641_v19 }
 0x5ba   : > { %v1520_v12 = vpop.f32.mrf.mxu0  ;;  %v1818_v7 = vmul.f32 %v1802_v41, %v1578_v63  ;;  %2655 = vpow2.f32 %v1831_v31  ;;  %v1835_v11 = vmul.f32 1.442695, %v1817_v38  ;;  %v1803_v39 = vsub.f32 0.0, %v1579_v13 }
 0x5bb   : > { %v1581_v54 = vand.u32 2147483647, %v3648_v36  ;;  %2657 = vrcp.f32 %v1608_v53  ;;  %v1610_v22 = vadd.f32 1.0, %v1594_v55  ;;  %v1595_v4 = vmul.f32 0.3275911, %v1579_v13 }
 0x5bc   : > { %v1522_v9 = vpop.f32.mrf.mxu0  ;;  %v3652_v14 = vmul.f32 0.70710677, %v3644_v37  ;;  %2659 = vpow2.f32 %v1833_v61  ;;  %v1804_v58 = vsub.f32 0.0, %v1580_v35  ;;  %v3659_v0 = vadd.f32 %v1520_v12, %v3598_v16 }
 0x5bd   : > { %2661 = vrcp.f32 %v1609_v56  ;;  %v1837_v40 = vmul.f32 1.442695, %v1818_v7  ;;  %v1819_v24 = vmul.f32 %v1803_v39, %v1579_v13  ;;  %v1596_v25 = vmul.f32 0.3275911, %v1580_v35 }
 0x5be   : > { %v1526_v2 = vpop.f32.mrf.mxu0  ;;  %v1582_v23 = vand.u32 2147483647, %v3652_v14  ;;  %2663 = vpow2.f32 %v1835_v11  ;;  %v1805_v30 = vsub.f32 0.0, %v1581_v54  ;;  %v1611_v3 = vadd.f32 1.0, %v1595_v4 }
 0x5bf   : > { %2665 = vrcp.f32 %v1610_v22  ;;  %v3664_v18 = vadd.f32 %v1522_v9, %v3600_v5  ;;  %v1820_v42 = vmul.f32 %v1804_v58, %v1580_v35  ;;  %v3667_v48 = vmul.f32 0.70710677, %v3659_v0 }
 0x5c0   : > { %v1806_v63 = vsub.f32 0.0, %v1582_v23  ;;  %v3670_v21 = vadd.f32 %v1526_v2, %v3598_v16  ;;  %v1528_v43 = vpop.f32.mrf.mxu0  ;;  %v3674_v47 = vmul.f32 0.5, %v3606_v62  ;;  %2667 = vpow2.f32 %v1837_v40 }
 0x5c1   : > { %v1597_v12 = vmul.f32 0.3275911, %v1581_v54  ;;  %v1839_v49 = vmul.f32 1.442695, %v1819_v24  ;;  %v1612_v41 = vadd.f32 1.0, %v1596_v25  ;;  %v1821_v31 = vmul.f32 %v1805_v30, %v1581_v54 }
 0x5c2   : > { %v3654_v1 = vpop.eup %2653  ;;  %4111 = vst [vmem:[#allocation31_spill] sm:$0xff] %v3670_v21  ;;  %v1583_v38 = vand.u32 2147483647, %v3667_v48  ;;  %2669 = vrcp.f32 %v1611_v3  ;;  %v1598_v53 = vmul.f32 0.3275911, %v1582_v23  ;;  %v1822_v35 = vmul.f32 %v1806_v63, %v1582_v23  ;;  %v1532_v62 = vpop.f32.mrf.mxu0 }
 0x5c3   : > { %v1655_v59 = vmul.f32 1.0614054, %v3654_v1  ;;  %v3678_v55 = vmul.f32 0.70710677, %v3664_v18  ;;  %v1841_v61 = vmul.f32 1.442695, %v1820_v42  ;;  %2671 = vpow2.f32 %v1839_v49 }
 0x5c4   : > { %v1807_v9 = vsub.f32 0.0, %v1583_v38  ;;  %v3681_v56 = vmul.f32 0.70710677, %v3670_v21  ;;  %v1613_v11 = vadd.f32 1.0, %v1597_v12  ;;  %v1599_v39 = vmul.f32 0.3275911, %v1583_v38  ;;  %v1534_v3 = vpop.f32.mrf.mxu0 }
 0x5c5   : > { %v1671_v26 = vadd.f32 -1.4531521, %v1655_v59  ;;  %v1584_v54 = vand.u32 2147483647, %v3678_v55  ;;  %v3686_v22 = vmul.f32 0.5, %v3613_v20  ;;  %2673 = vrcp.f32 %v1612_v41 }
 0x5c6   : > { %v1843_v4 = vmul.f32 1.442695, %v1821_v31  ;;  %v1585_v58 = vand.u32 2147483647, %v3681_v56  ;;  %v1614_v40 = vadd.f32 1.0, %v1598_v53  ;;  %v3690_v23 = vadd.f32 %v1528_v43, %v3600_v5 }
 0x5c7   : > { %v1687_v28 = vmul.f32 %v3654_v1, %v1671_v26  ;;  %v2656_v2 = vpop.eup %2655  ;;  %2675 = vpow2.f32 %v1841_v61  ;;  %v1845_v25 = vmul.f32 1.442695, %v1822_v35  ;;  %v1823_v30 = vmul.f32 %v1807_v9, %v1583_v38 }
 0x5c8   : > { %v3692_v24 = vpop.eup %2657  ;;  %v1808_v26 = vsub.f32 0.0, %v1584_v54  ;;  %2677 = vrcp.f32 %v1613_v11  ;;  %v1615_v63 = vadd.f32 1.0, %v1599_v39  ;;  %v1601_v49 = vmul.f32 0.3275911, %v1585_v58  ;;  %v1538_v11 = vpop.f32.mrf.mxu0 }
 0x5c9   : > { %v1703_v13 = vadd.f32 1.4214138, %v1687_v28  ;;  %v3694_v20 = vpop.eup %2659  ;;  %v1600_v28 = vmul.f32 0.3275911, %v1584_v54  ;;  %2679 = vpow2.f32 %v1843_v4  ;;  %v1809_v43 = vsub.f32 0.0, %v1585_v58 }
 0x5ca   : > { %v3697_v12 = vpop.eup %2661  ;;  %v3700_v41 = vmul.f32 0.70710677, %v3690_v23  ;;  %2681 = vrcp.f32 %v1614_v40  ;;  %v3708_v53 = vadd.f32 %v1532_v62, %v3598_v16  ;;  %v1847_v35 = vmul.f32 1.442695, %v1823_v30 }
 0x5cb   : > { %v1719_v7 = vmul.f32 %v3654_v1, %v1703_v13  ;;  %v3702_v31 = vpop.eup %2663  ;;  %v3705_v13 = vmul.f32 0.5, %v3620_v50  ;;  %2683 = vpow2.f32 %v1845_v25  ;;  %v1824_v9 = vmul.f32 %v1808_v26, %v1584_v54 }
 0x5cc   : > { %4112 = vst [vmem:[#allocation32_spill] sm:$0xff] %v3700_v41  ;;  %4113 = vst [vmem:[#allocation33_spill] sm:$0xff] %v3708_v53  ;;  %v3710_v61 = vpop.eup %2665  ;;  %2685 = vrcp.f32 %v1615_v63  ;;  %v1616_v4 = vadd.f32 1.0, %v1600_v28  ;;  %v3716_v50 = vmul.f32 0.70710677, %v3708_v53  ;;  %v1617_v62 = vadd.f32 1.0, %v1601_v49 }
 0x5cd   : > { %v1735_v59 = vadd.f32 -0.28449672, %v1719_v7  ;;  %v1586_v7 = vand.u32 2147483647, %v3700_v41  ;;  %v1825_v40 = vmul.f32 %v1809_v43, %v1585_v58  ;;  %v3721_v17 = vadd.f32 %v1534_v3, %v3600_v5  ;;  %v1540_v43 = vpop.f32.mrf.mxu0 }
 0x5ce   : > { %4114 = vst [vmem:[#allocation34_spill] sm:$0xff] %v3716_v50  ;;  %v1587_v30 = vand.u32 2147483647, %v3716_v50  ;;  %v3725_v26 = vadd.f32 %v1538_v11, %v3598_v16  ;;  %2687 = vpow2.f32 %v1847_v35  ;;  %v1849_v63 = vmul.f32 1.442695, %v1824_v9 }
 0x5cf   : > { %v1751_v42 = vmul.f32 %v3654_v1, %v1735_v59  ;;  %v3718_v59 = vpop.eup %2667  ;;  %4115 = vst [vmem:[#allocation35_spill] sm:$0xff] %v3721_v17  ;;  %v1602_v54 = vmul.f32 0.3275911, %v1586_v7  ;;  %2689 = vrcp.f32 %v1616_v4  ;;  %v3744_v4 = vmul.f32 0.5, %v3631_v33 }
 0x5d0   : > { %4116 = vst [vmem:[#allocation36_spill] sm:$0xff] %v3725_v26  ;;  %v1603_v49 = vmul.f32 0.3275911, %v1587_v30  ;;  %v1811_v3 = vsub.f32 0.0, %v1587_v30  ;;  %2691 = vrcp.f32 %v1617_v62  ;;  %v3747_v62 = vadd.f32 %v1540_v43, %v3600_v5 }
 0x5d1   : > { %v1767_v38 = vadd.f32 0.2548296, %v1751_v42  ;;  %v1810_v42 = vsub.f32 0.0, %v1586_v7  ;;  %v1618_v9 = vadd.f32 1.0, %v1602_v54  ;;  %2693 = vpow2.f32 %v1849_v63 }
 0x5d2   : > { %4119 = vst [vmem:[#allocation39_spill] sm:$0xff] %v3747_v62  ;;  %v1619_v54 = vadd.f32 1.0, %v1603_v49  ;;  %v3757_v60 = vmul.f32 0.5, %v3641_v19  ;;  %v3760_v33 = vmul.f32 0.5, %v3644_v37  ;;  %v3773_v19 = vmul.f32 0.70710677, %v3747_v62 }
 0x5d3   : > { %v1783_v39 = vmul.f32 %v3654_v1, %v1767_v38  ;;  %v3727_v1 = vpop.eup %2669  ;;  %v1826_v28 = vmul.f32 %v1810_v42, %v1586_v7  ;;  %v3730_v38 = vmul.f32 0.70710677, %v3721_v17  ;;  %v1827_v7 = vmul.f32 %v1811_v3, %v1587_v30 }
 0x5d4   : > { %v3736_v11 = vpop.eup %2671  ;;  %v3739_v42 = vmul.f32 0.70710677, %v3725_v26  ;;  %4121 = vst [vmem:[#allocation41_spill] sm:$0xff] %v3773_v19  ;;  %vm1898_vm11 = vcmp.ge.f32.partialorder %v3624_v52, 0.0  ;;  %vm1900_vm13 = vcmp.ge.f32.partialorder %v3637_v10, 0.0  ;;  %vm1899_vm14 = vcmp.ge.f32.partialorder %v3634_v29, 0.0 }
 0x5d5   : > { %v1863_v25 = vmul.f32 %v2656_v2, %v1783_v39  ;;  %4117 = vst [vmem:[#allocation37_spill] sm:$0xff] %v3730_v38  ;;  %v3733_v2 = vmul.f32 0.5, %v3628_v32  ;;  %v1851_v39 = vmul.f32 1.442695, %v1825_v40  ;;  %v1588_v16 = vand.u32 2147483647, %v3730_v38 }
 0x5d6   : > { %4118 = vst [vmem:[#allocation38_spill] sm:$0xff] %v3739_v42  ;;  %v1853_v32 = vmul.f32 1.442695, %v1826_v28  ;;  %v1589_v3 = vand.u32 2147483647, %v3739_v42  ;;  %v3765_v28 = vmul.f32 0.5, %v3659_v0 }
 0x5d7   : > { %v1879_v58 = vsub.f32 1.0, %v1863_v25  ;;  %v3741_v25 = vpop.eup %2673  ;;  %v1812_v30 = vsub.f32 0.0, %v1588_v16  ;;  %2695 = vpow2.f32 %v1851_v39  ;;  %v1604_v5 = vmul.f32 0.3275911, %v1588_v16 }
 0x5d8   : > { %v3749_v40 = vpop.eup %2675  ;;  %4120 = vst [vmem:[#allocation40_spill] sm:$0xff] %v3765_v28  ;;  %2697 = vrcp.f32 %v1618_v9  ;;  %v1855_v34 = vmul.f32 1.442695, %v1827_v7  ;;  %v1656_v0 = vmul.f32 1.0614054, %v3692_v24  ;;  %vm1901_vm15 = vcmp.ge.f32.partialorder %v3648_v36, 0.0 }
 0x5d9   : > { %v1911_v35 = vsub.f32 0.0, %v1879_v58  ;;  %v3754_v44 = vpop.eup %2677  ;;  %2699 = vpow2.f32 %v1853_v32  ;;  %v1828_v39 = vmul.f32 %v1812_v30, %v1588_v16  ;;  %v1658_v9 = vmul.f32 1.0614054, %v3710_v61 }
 0x5da   : > { %v3762_v63 = vpop.eup %2679  ;;  %2701 = vrcp.f32 %v1619_v54  ;;  %v1620_v8 = vadd.f32 1.0, %v1604_v5  ;;  %v1605_v32 = vmul.f32 0.3275911, %v1589_v3  ;;  %v1672_v46 = vadd.f32 -1.4531521, %v1656_v0 }
 0x5db   : > { %v1927_v27 = vsel %vm1895_vm9, %v1879_v58, %v1911_v35  ;;  %v1813_v58 = vsub.f32 0.0, %v1589_v3  ;;  %v3767_v49 = vpop.eup %2681  ;;  %v3770_v35 = vmul.f32 0.5, %v3664_v18  ;;  %v1657_v18 = vmul.f32 1.0614054, %v3697_v12 }
 0x5dc   : > { %v1943_v43 = vadd.f32 1.0, %v1927_v27  ;;  %v3775_v37 = vpop.eup %2683  ;;  %v1590_v27 = vand.u32 2147483647, %v3773_v19  ;;  %2703 = vpow2.f32 %v1855_v34  ;;  %v1674_v15 = vadd.f32 -1.4531521, %v1658_v9 }
 0x5dd   : > { %v3779_v7 = vpop.eup %2685  ;;  %v1829_v6 = vmul.f32 %v1813_v58, %v1589_v3  ;;  %v1673_v30 = vadd.f32 -1.4531521, %v1657_v18  ;;  %v1857_v62 = vmul.f32 1.442695, %v1828_v39  ;;  %v1688_v5 = vmul.f32 %v3692_v24, %v1672_v46 }
 0x5de   : > { %v3784_v26 = vmul.f32 %v1943_v43, %v3656_v57  ;;  %v1606_v16 = vmul.f32 0.3275911, %v1590_v27  ;;  %v1814_v54 = vsub.f32 0.0, %v1590_v27  ;;  %v3786_v42 = vpop.eup %2687  ;;  %v1690_v58 = vmul.f32 %v3710_v61, %v1674_v15 }
 0x5df   : > { %v1660_v19 = vmul.f32 1.0614054, %v3741_v25  ;;  %v3791_v53 = vpop.eup %2689  ;;  %v3793_v3 = vmul.f32 1.442695, %v1829_v6  ;;  %v1689_v57 = vmul.f32 %v3697_v12, %v1673_v30  ;;  %v1659_v43 = vmul.f32 1.0614054, %v3727_v1 }
 0x5e0   : > { %v1830_v34 = vmul.f32 %v1814_v54, %v1590_v27  ;;  %v3797_v0 = vpop.eup %2691  ;;  %2705 = vrcp.f32 %v1620_v8  ;;  %v1704_v9 = vadd.f32 1.4214138, %v1688_v5  ;;  %v1706_v39 = vadd.f32 1.4214138, %v1690_v58 }
 0x5e1   : > { %v1676_v18 = vadd.f32 -1.4531521, %v1660_v19  ;;  %v1621_v46 = vadd.f32 1.0, %v1605_v32  ;;  %v1622_v17 = vadd.f32 1.0, %v1606_v16  ;;  %v1705_v15 = vadd.f32 1.4214138, %v1689_v57  ;;  %v3799_v21 = vpop.eup %2693 }
 0x5e2   : > { %v1675_v50 = vadd.f32 -1.4531521, %v1659_v43  ;;  %v1720_v6 = vmul.f32 %v3692_v24, %v1704_v9  ;;  %v1722_v27 = vmul.f32 %v3710_v61, %v1706_v39  ;;  %v1662_v30 = vmul.f32 1.0614054, %v3767_v49 }
 0x5e3   : > { %v1692_v54 = vmul.f32 %v3741_v25, %v1676_v18  ;;  %v3805_v28 = vmul.f32 1.442695, %v1830_v34  ;;  %v1721_v8 = vmul.f32 %v3697_v12, %v1705_v15  ;;  %v1661_v32 = vmul.f32 1.0614054, %v3754_v44 }
 0x5e4   : > { %v1691_v19 = vmul.f32 %v3727_v1, %v1675_v50  ;;  %v3810_v16 = vpop.eup %2695  ;;  %2707 = vpow2.f32 %v1857_v62  ;;  %v1736_v5 = vadd.f32 -0.28449672, %v1720_v6  ;;  %v1738_v58 = vadd.f32 -0.28449672, %v1722_v27 }
 0x5e5   : > { %4122 = vst [vmem:[#allocation42_spill] sm:$0xff] %v3810_v16  ;;  %v1708_v57 = vadd.f32 1.4214138, %v1692_v54  ;;  %v3812_v43 = vpop.eup %2697  ;;  %2709 = vrcp.f32 %v1621_v46  ;;  %v1737_v9 = vadd.f32 -0.28449672, %v1721_v8  ;;  %vm1902_vm0 = vcmp.ge.f32.partialorder %v3652_v14, 0.0 }
 0x5e6   : > { %v1707_v39 = vadd.f32 1.4214138, %v1691_v19  ;;  %v1678_v18 = vadd.f32 -1.4531521, %v1662_v30  ;;  %v3814_v34 = vpop.eup %2699  ;;  %v1752_v15 = vmul.f32 %v3692_v24, %v1736_v5  ;;  %v1754_v50 = vmul.f32 %v3710_v61, %v1738_v58 }
 0x5e7   : > { %v1724_v38 = vmul.f32 %v3741_v25, %v1708_v57  ;;  %v1677_v41 = vadd.f32 -1.4531521, %v1661_v32  ;;  %v3819_v16 = vpop.eup %2701  ;;  %v1753_v62 = vmul.f32 %v3697_v12, %v1737_v9  ;;  %v1664_v27 = vmul.f32 1.0614054, %v3791_v53 }
 0x5e8   : > { %v1723_v6 = vmul.f32 %v3727_v1, %v1707_v39  ;;  %v1694_v46 = vmul.f32 %v3767_v49, %v1678_v18  ;;  %v1768_v54 = vadd.f32 0.2548296, %v1752_v15  ;;  %v1770_v30 = vadd.f32 0.2548296, %v1754_v50 }
 0x5e9   : > { %v1740_v8 = vadd.f32 -0.28449672, %v1724_v38  ;;  %v1693_v19 = vmul.f32 %v3754_v44, %v1677_v41  ;;  %v3826_v5 = vpop.eup %2703  ;;  %2711 = vrcp.f32 %v1622_v17  ;;  %v1769_v32 = vadd.f32 0.2548296, %v1753_v62 }
 0x5ea   : > { %4123 = vst [vmem:[#allocation43_spill] sm:$0xff] %v3826_v5  ;;  %v1739_v58 = vadd.f32 -0.28449672, %v1723_v6  ;;  %v1710_v57 = vadd.f32 1.4214138, %v1694_v46  ;;  %v1784_v9 = vmul.f32 %v3692_v24, %v1768_v54  ;;  %v1786_v39 = vmul.f32 %v3710_v61, %v1770_v30 }
 0x5eb   : > { %v1756_v38 = vmul.f32 %v3741_v25, %v1740_v8  ;;  %v1709_v18 = vadd.f32 1.4214138, %v1693_v19  ;;  %v1785_v41 = vmul.f32 %v3697_v12, %v1769_v32  ;;  %v1680_v5 = vadd.f32 -1.4531521, %v1664_v27 }
 0x5ec   : > { %v1755_v15 = vmul.f32 %v3727_v1, %v1739_v58  ;;  %v1726_v50 = vmul.f32 %v3767_v49, %v1710_v57  ;;  %v1864_v17 = vmul.f32 %v3694_v20, %v1784_v9  ;;  %v1866_v62 = vmul.f32 %v3718_v59, %v1786_v39 }
 0x5ed   : > { %v1772_v6 = vadd.f32 0.2548296, %v1756_v38  ;;  %v1725_v46 = vmul.f32 %v3754_v44, %v1709_v18  ;;  %v3840_v24 = vpop.eup %2705  ;;  %v1865_v61 = vmul.f32 %v3702_v31, %v1785_v41  ;;  %v1696_v30 = vmul.f32 %v3791_v53, %v1680_v5 }
 0x5ee   : > { %v1771_v54 = vadd.f32 0.2548296, %v1755_v15  ;;  %v1742_v12 = vadd.f32 -0.28449672, %v1726_v50  ;;  %v1880_v27 = vsub.f32 1.0, %v1864_v17  ;;  %v1882_v8 = vsub.f32 1.0, %v1866_v62 }
 0x5ef   : > { %v1788_v20 = vmul.f32 %v3741_v25, %v1772_v6  ;;  %v1741_v59 = vadd.f32 -0.28449672, %v1725_v46  ;;  %v1881_v19 = vsub.f32 1.0, %v1865_v61  ;;  %v1712_v57 = vadd.f32 1.4214138, %v1696_v30 }
 0x5f0   : > { %v1787_v32 = vmul.f32 %v3727_v1, %v1771_v54  ;;  %v1758_v58 = vmul.f32 %v3767_v49, %v1742_v12  ;;  %v1912_v9 = vsub.f32 0.0, %v1880_v27  ;;  %v1914_v39 = vsub.f32 0.0, %v1882_v8 }
 0x5f1   : > { %v1868_v31 = vmul.f32 %v3749_v40, %v1788_v20  ;;  %v1757_v38 = vmul.f32 %v3754_v44, %v1741_v59  ;;  %v3851_v5 = vpop.eup %2707  ;;  %v1913_v18 = vsub.f32 0.0, %v1881_v19  ;;  %v1728_v25 = vmul.f32 %v3791_v53, %v1712_v57 }
 0x5f2   : > { %v1867_v41 = vmul.f32 %v3736_v11, %v1787_v32  ;;  %v1774_v15 = vadd.f32 0.2548296, %v1758_v58  ;;  %v3855_v50 = vpop.eup %2709  ;;  %v1928_v1 = vsel %vm1896_vm10, %v1880_v27, %v1912_v9  ;;  %v1930_v17 = vsel %vm1898_vm11, %v1882_v8, %v1914_v39 }
 0x5f3   : > { %v1884_v62 = vsub.f32 1.0, %v1868_v31  ;;  %v1773_v40 = vadd.f32 0.2548296, %v1757_v38  ;;  %v1944_v6 = vadd.f32 1.0, %v1928_v1  ;;  %v1946_v46 = vadd.f32 1.0, %v1930_v17 }
 0x5f4   : > { %v1929_v11 = vsel %vm1897_vm12, %v1881_v19, %v1913_v18  ;;  %v1883_v61 = vsub.f32 1.0, %v1867_v41  ;;  %v1790_v51 = vmul.f32 %v3767_v49, %v1774_v15  ;;  %v1744_v20 = vadd.f32 -0.28449672, %v1728_v25 }
 0x5f5   : > { %v1945_v54 = vadd.f32 1.0, %v1929_v11  ;;  %v1916_v12 = vsub.f32 0.0, %v1884_v62  ;;  %v1789_v30 = vmul.f32 %v3754_v44, %v1773_v40  ;;  %v1960_v52 = vmul.f32 %v1944_v6, %v3674_v47 }
 0x5f6   : > { %v1962_v27 = vmul.f32 %v1946_v46, %v3705_v13  ;;  %v1915_v8 = vsub.f32 0.0, %v1883_v61  ;;  %v3869_v59 = vpop.eup %2711  ;;  %v1870_v19 = vmul.f32 %v3775_v37, %v1790_v51  ;;  %v1760_v47 = vmul.f32 %v3791_v53, %v1744_v20 }
 0x5f7   : > { %v1961_v32 = vmul.f32 %v1945_v54, %v3686_v22  ;;  %v1932_v45 = vsel %vm1900_vm13, %v1884_v62, %v1916_v12  ;;  %v1869_v58 = vmul.f32 %v3762_v63, %v1789_v30  ;;  %2078 = vmatprep.mubr.f32.mxu1 %v1960_v52  ;;  %v1663_v13 = vmul.f32 1.0614054, %v3779_v7 }
 0x5f8   : > { %v1948_v49 = vadd.f32 1.0, %v1932_v45  ;;  %v1931_v44 = vsel %vm1899_vm14, %v1883_v61, %v1915_v8  ;;  %2079 = vmatmul.mubr.f32.vlgmr.msra.gmra.mxu1 %v3784_v26  ;;  %v1886_v22 = vsub.f32 1.0, %v1870_v19  ;;  %v1666_v10 = vmul.f32 1.0614054, %v3812_v43 }
 0x5f9   : > { %v1947_v57 = vadd.f32 1.0, %v1931_v44  ;;  %v1885_v9 = vsub.f32 1.0, %v1869_v58  ;;  %2083 = vmatprep.mubr.f32.mxu1 %v1962_v27  ;;  %v1776_v63 = vadd.f32 0.2548296, %v1760_v47  ;;  %v1679_v39 = vadd.f32 -1.4531521, %v1663_v13 }
 0x5fa   : > { %v1964_v37 = vmul.f32 %v1948_v49, %v3744_v4  ;;  %v1665_v31 = vmul.f32 1.0614054, %v3797_v0  ;;  %vm1904_vm1 = vcmp.ge.f32.partialorder %v3678_v55, 0.0  ;;  %v1918_v38 = vsub.f32 0.0, %v1886_v22 }
 0x5fb   : > { %v1963_v29 = vmul.f32 %v1947_v57, %v3733_v2  ;;  %v1917_v18 = vsub.f32 0.0, %v1885_v9  ;;  %v1682_v41 = vadd.f32 -1.4531521, %v1666_v10  ;;  %v1792_v26 = vmul.f32 %v3791_v53, %v1776_v63 }
 0x5fc   : > { %v1695_v15 = vmul.f32 %v3779_v7, %v1679_v39  ;;  %v1681_v25 = vadd.f32 -1.4531521, %v1665_v31  ;;  %v1668_v1 = vmul.f32 1.0614054, %v3840_v24  ;;  %2084 = vmatmul.mubr.f32.gmra.mxu1 %v1961_v32  ;;  %v1934_v4 = vsel %vm1902_vm0, %v1886_v22, %v1918_v38 }
 0x5fd   : > { %v1933_v17 = vsel %vm1901_vm15, %v1885_v9, %v1917_v18  ;;  %v1698_v62 = vmul.f32 %v3812_v43, %v1682_v41  ;;  %v1667_v2 = vmul.f32 1.0614054, %v3819_v16  ;;  %2088 = vmatprep.mubr.f32.mxu1 %v1964_v37  ;;  %v1950_v40 = vadd.f32 1.0, %v1934_v4 }
 0x5fe   : > { %v1949_v6 = vadd.f32 1.0, %v1933_v17  ;;  %v1872_v53 = vmul.f32 %v3799_v21, %v1792_v26  ;;  %v1711_v46 = vadd.f32 1.4214138, %v1695_v15  ;;  %v1697_v61 = vmul.f32 %v3797_v0, %v1681_v25 }
 0x5ff   : > { %v1714_v11 = vadd.f32 1.4214138, %v1698_v62  ;;  %v1684_v54 = vadd.f32 -1.4531521, %v1668_v1  ;;  %v1683_v12 = vadd.f32 -1.4531521, %v1667_v2  ;;  %2713 = vpow2.f32 %v3805_v28 }
 0x600   : > { %v1966_v36 = vmul.f32 %v1950_v40, %v3760_v33  ;;  %v1888_v14 = vsub.f32 1.0, %v1872_v53  ;;  %v1727_v51 = vmul.f32 %v3779_v7, %v1711_v46  ;;  %2089 = vmatmul.mubr.f32.gmra.mxu1 %v1963_v29  ;;  %v1713_v52 = vadd.f32 1.4214138, %v1697_v61 }
 0x601   : > { %v1730_v30 = vmul.f32 %v3812_v43, %v1714_v11  ;;  %v1700_v27 = vmul.f32 %v3840_v24, %v1684_v54  ;;  %v1699_v21 = vmul.f32 %v3819_v16, %v1683_v12  ;;  %v1965_v8 = vmul.f32 %v1949_v6, %v3757_v60  ;;  %v4124_v54 = vld [vmem:[#allocation42_spill] sm:$0xff] }
 0x602   : > { %2093 = vmatprep.mubr.f32.mxu1 %v1966_v36  ;;  %v1920_v20 = vsub.f32 0.0, %v1888_v14  ;;  %v1743_v32 = vadd.f32 -0.28449672, %v1727_v51  ;;  %v1670_v28 = vmul.f32 1.0614054, %v3869_v59  ;;  %v1729_v33 = vmul.f32 %v3797_v0, %v1713_v52 }
 0x603   : > { %v1746_v45 = vadd.f32 -0.28449672, %v1730_v30  ;;  %v1716_v19 = vadd.f32 1.4214138, %v1700_v27  ;;  %v1715_v58 = vadd.f32 1.4214138, %v1699_v21  ;;  %2715 = vpow2.f32 %v3793_v3 }
 0x604   : > { %v1936_v49 = vsel %vm1904_vm1, %v1888_v14, %v1920_v20  ;;  %v1759_v44 = vmul.f32 %v3779_v7, %v1743_v32  ;;  %v1686_v47 = vadd.f32 -1.4531521, %v1670_v28  ;;  %v1669_v13 = vmul.f32 1.0614054, %v3855_v50  ;;  %2094 = vmatmul.mubr.f32.gmra.mxu1 %v1965_v8  ;;  %v4125_v30 = vld [vmem:[#allocation32_spill] sm:$0xff]  ;;  %v4126_v8 = vld [vmem:[#allocation43_spill] sm:$0xff] }
 0x605   : > { %v1952_v57 = vadd.f32 1.0, %v1936_v49  ;;  %v1762_v60 = vmul.f32 %v3812_v43, %v1746_v45  ;;  %v1745_v22 = vadd.f32 -0.28449672, %v1729_v33  ;;  %v1732_v9 = vmul.f32 %v3840_v24, %v1716_v19 }
 0x606   : > { %v1775_v10 = vadd.f32 0.2548296, %v1759_v44  ;;  %v1731_v37 = vmul.f32 %v3819_v16, %v1715_v58  ;;  %v1702_v63 = vmul.f32 %v3869_v59, %v1686_v47  ;;  %v1685_v39 = vadd.f32 -1.4531521, %v1669_v13  ;;  %v4127_v47 = vld [vmem:[#allocation37_spill] sm:$0xff] }
 0x607   : > { %vm1903_vm2 = vcmp.ge.f32.partialorder %v3667_v48, 0.0  ;;  %v1968_v55 = vmul.f32 %v1952_v57, %v3770_v35  ;;  %v1778_v31 = vadd.f32 0.2548296, %v1762_v60  ;;  %v1761_v29 = vmul.f32 %v3797_v0, %v1745_v22 }
 0x608   : > { %v1748_v38 = vadd.f32 -0.28449672, %v1732_v9  ;;  %v1791_v18 = vmul.f32 %v3779_v7, %v1775_v10  ;;  %v1747_v41 = vadd.f32 -0.28449672, %v1731_v37  ;;  %v1718_v26 = vadd.f32 1.4214138, %v1702_v63 }
 0x609   : > { %v1701_v15 = vmul.f32 %v3855_v50, %v1685_v39  ;;  %2098 = vmatprep.mubr.f32.mxu1 %v1968_v55  ;;  %v1794_v25 = vmul.f32 %v3812_v43, %v1778_v31  ;;  %v1777_v1 = vadd.f32 0.2548296, %v1761_v29  ;;  %vm1905_vm3 = vcmp.ge.f32.partialorder %v3681_v56, 0.0  ;;  %v4129_v37 = vld [vmem:[#allocation31_spill] sm:$0xff]  ;;  %v4130_v39 = vld [vmem:[#allocation34_spill] sm:$0xff] }
 0x60a   : > { %v1764_v4 = vmul.f32 %v3840_v24, %v1748_v38  ;;  %v1871_v35 = vmul.f32 %v3786_v42, %v1791_v18  ;;  %v1763_v17 = vmul.f32 %v3819_v16, %v1747_v41  ;;  %v1734_v62 = vmul.f32 %v3869_v59, %v1718_v26  ;;  %v4131_v29 = vld [vmem:[#allocation35_spill] sm:$0xff] }
 0x60b   : > { %v1717_v2 = vadd.f32 1.4214138, %v1701_v15  ;;  %v1874_v7 = vmul.f32 %v3814_v34, %v1794_v25  ;;  %v1793_v40 = vmul.f32 %v3797_v0, %v1777_v1  ;;  %v1554_v42 = vmul.f32 0.5, %v3690_v23 }
 0x60c   : > { %v1780_v3 = vadd.f32 0.2548296, %v1764_v4  ;;  %v1887_v6 = vsub.f32 1.0, %v1871_v35  ;;  %v1779_v53 = vadd.f32 0.2548296, %v1763_v17  ;;  %v2714_v11 = vpop.eup %2713  ;;  %vm1906_vm4 = vcmp.ge.f32.partialorder %v4125_v30, 0.0 }
 0x60d   : > { %v1750_v43 = vadd.f32 -0.28449672, %v1734_v62  ;;  %v1733_v46 = vmul.f32 %v3855_v50, %v1717_v2  ;;  %v1890_v61 = vsub.f32 1.0, %v1874_v7  ;;  %v1873_v12 = vmul.f32 %v4124_v54, %v1793_v40  ;;  %v4132_v35 = vld [vmem:[#allocation33_spill] sm:$0xff]  ;;  %v4134_v7 = vld [vmem:[#allocation39_spill] sm:$0xff] }
 0x60e   : > { %v1796_v36 = vmul.f32 %v3840_v24, %v1780_v3  ;;  %v1919_v14 = vsub.f32 0.0, %v1887_v6  ;;  %v1795_v51 = vmul.f32 %v3819_v16, %v1779_v53  ;;  %vm1908_vm5 = vcmp.ge.f32.partialorder %v4127_v47, 0.0  ;;  %v4133_v62 = vld [vmem:[#allocation41_spill] sm:$0xff] }
 0x60f   : > { %v1766_v34 = vmul.f32 %v3869_v59, %v1750_v43  ;;  %v1749_v0 = vadd.f32 -0.28449672, %v1733_v46  ;;  %v1922_v52 = vsub.f32 0.0, %v1890_v61  ;;  %v1889_v27 = vsub.f32 1.0, %v1873_v12  ;;  %v4135_v43 = vld [vmem:[#allocation38_spill] sm:$0xff] }
 0x610   : > { %v1876_v21 = vmul.f32 %v3851_v5, %v1796_v36  ;;  %v1935_v23 = vsel %vm1903_vm2, %v1887_v6, %v1919_v14  ;;  %v1875_v20 = vmul.f32 %v4126_v8, %v1795_v51  ;;  %v4128_v5 = vld [vmem:[#allocation40_spill] sm:$0xff]  ;;  %v1553_v63 = vmul.f32 0.5, %v4129_v37  ;;  %v2716_v31 = vpop.eup %2715  ;;  %v2320_v14 = vld [vmem:[%s4039_s12] ss:$0 sm:$0xff] }
 0x611   : > { %v1782_v32 = vadd.f32 0.2548296, %v1766_v34  ;;  %v1765_v24 = vmul.f32 %v3855_v50, %v1749_v0  ;;  %v1951_v28 = vadd.f32 1.0, %v1935_v23  ;;  %v1938_v45 = vsel %vm1906_vm4, %v1890_v61, %v1922_v52  ;;  %v4141_v37 = vld [vmem:[#allocation28_spill] sm:$0xff] }
 0x612   : > { %v1921_v16 = vsub.f32 0.0, %v1889_v27  ;;  %v1892_v33 = vsub.f32 1.0, %v1876_v21  ;;  %v1954_v19 = vadd.f32 1.0, %v1938_v45  ;;  %v1891_v58 = vsub.f32 1.0, %v1875_v20 }
 0x613   : > { %v1798_v49 = vmul.f32 %v3869_v59, %v1782_v32  ;;  %v1781_v44 = vadd.f32 0.2548296, %v1765_v24  ;;  %v1967_v13 = vmul.f32 %v1951_v28, %v4128_v5  ;;  %vm1907_vm6 = vcmp.ge.f32.partialorder %v4130_v39, 0.0  ;;  %v4138_v24 = vld [vmem:[#allocation23_spill] sm:$0xff]  ;;  %v4140_v5 = vld [vmem:[#allocation25_spill] sm:$0xff] }
 0x614   : > { %v1937_v48 = vsel %vm1905_vm3, %v1889_v27, %v1921_v16  ;;  %v1924_v57 = vsub.f32 0.0, %v1892_v33  ;;  %v1970_v60 = vmul.f32 %v1954_v19, %v1554_v42  ;;  %v1923_v9 = vsub.f32 0.0, %v1891_v58  ;;  %v4136_v42 = vld [vmem:[#allocation36_spill] sm:$0xff] }
 0x615   : > { %v1953_v22 = vadd.f32 1.0, %v1937_v48  ;;  %v1878_v10 = vmul.f32 %v2714_v11, %v1798_v49  ;;  %2099 = vmatmul.mubr.f32.gmra.mxu1 %v1967_v13  ;;  %v1797_v59 = vmul.f32 %v3855_v50, %v1781_v44  ;;  %v1556_v38 = vmul.f32 0.5, %v4131_v29  ;;  %v4137_v27 = vld [vmem:[#allocation24_spill] sm:$0xff]  ;;  %v4142_v29 = vld [vmem:[#allocation27_spill] sm:$0xff] }
 0x616   : > { %v1940_v55 = vsel %vm1908_vm5, %v1892_v33, %v1924_v57  ;;  %2103 = vmatprep.mubr.f32.mxu1 %v1970_v60  ;;  %v1939_v56 = vsel %vm1907_vm6, %v1891_v58, %v1923_v9  ;;  %v1555_v17 = vmul.f32 0.5, %v4132_v35  ;;  %vm1910_vm7 = vcmp.ge.f32.partialorder %v4133_v62, 0.0  ;;  %v4139_v58 = vld [vmem:[#allocation26_spill] sm:$0xff]  ;;  %v4144_v35 = vld [vmem:[#allocation29_spill] sm:$0xff] }
 0x617   : > { %v1956_v18 = vadd.f32 1.0, %v1940_v55  ;;  %v1894_v41 = vsub.f32 1.0, %v1878_v10  ;;  %v1969_v26 = vmul.f32 %v1953_v22, %v1553_v63  ;;  %v1955_v15 = vadd.f32 1.0, %v1939_v56 }
 0x618   : > { %v1877_v25 = vmul.f32 %v2716_v31, %v1797_v59  ;;  %v1558_v40 = vmul.f32 0.5, %v4134_v7  ;;  %vm1909_vm8 = vcmp.ge.f32.partialorder %v4135_v43, 0.0  ;;  %v1557_v61 = vmul.f32 0.5, %v4136_v42 }
 0x619   : > { %v1972_v1 = vmul.f32 %v1956_v18, %v1556_v38  ;;  %v1926_v4 = vsub.f32 0.0, %v1894_v41  ;;  %2104 = vmatmul.mubr.f32.gmra.mxu1 %v1969_v26  ;;  %v1971_v3 = vmul.f32 %v1955_v15, %v1555_v17  ;;  %v4143_v26 = vld [vmem:[#allocation30_spill] sm:$0xff] }
 0x61a   : > { %v1893_v2 = vsub.f32 1.0, %v1877_v25 }
 0x61b   : > { %2108 = vmatprep.mubr.f32.mxu1 %v1972_v1  ;;  %v1942_v50 = vsel %vm1910_vm7, %v1894_v41, %v1926_v4 }
 0x61c   : > { %v1958_v6 = vadd.f32 1.0, %v1942_v50  ;;  %v1925_v53 = vsub.f32 0.0, %v1893_v2 }
 0x61d   : > { %2109 = vmatmul.mubr.f32.gmra.mxu1 %v1971_v3 }
 0x61e   : > { %v1974_v46 = vmul.f32 %v1958_v6, %v1558_v40  ;;  %v1941_v11 = vsel %vm1909_vm8, %v1893_v2, %v1925_v53 }
 0x61f   : > { %v1957_v54 = vadd.f32 1.0, %v1941_v11 }
 0x620   : > { %2113 = vmatprep.mubr.f32.mxu1 %v1974_v46 }
 0x621   : > { %v1973_v12 = vmul.f32 %v1957_v54, %v1557_v61 }
 0x623   : > { %2114 = vmatmul.mubr.f32.gmra.mxu1 %v1973_v12 }
 0x6b8   : > { %v2392_v36 = vpop.f32.mrf.mxu1 }
 0x6ba   : > { %v2393_v51 = vpop.f32.mrf.mxu1 }
 0x6bb   : > { %v2394_v34 = vadd.f32 %v2393_v51, %v2392_v36 }
 0x6bc   : > { %v2395_v0 = vpop.f32.mrf.mxu1 }
 0x6bd   : > { %v2081_v30 = vadd.f32 %v2394_v34, %v2320_v14 }
 0x6be   : > { %v2396_v52 = vpop.f32.mrf.mxu1 }
 0x6bf   : > { %v2119_v21 = vadd.f32 %v2081_v30, %v4137_v27  ;;  %v2397_v23 = vadd.f32 %v2396_v52, %v2395_v0 }
 0x6c0   : > { %v2398_v8 = vpop.f32.mrf.mxu1 }
 0x6c1   : > { %2127 = vst [vmem:[%s3960_s6] sm:$0xff] %v2119_v21  ;;  %v2086_v20 = vadd.f32 %v2397_v23, %v2320_v14 }
 0x6c2   : > { %v2399_v32 = vpop.f32.mrf.mxu1 }
 0x6c3   : > { %v2120_v28 = vadd.f32 %v2086_v20, %v4138_v24  ;;  %v2400_v45 = vadd.f32 %v2399_v32, %v2398_v8 }
 0x6c4   : > { %v2401_v16 = vpop.f32.mrf.mxu1 }
 0x6c5   : > { %2128 = vst [vmem:[%s3960_s6 + $0x8] sm:$0xff] %v2120_v28  ;;  %v2091_v33 = vadd.f32 %v2400_v45, %v2320_v14 }
 0x6c6   : > { %v2402_v19 = vpop.f32.mrf.mxu1 }
 0x6c7   : > { %v2121_v49 = vadd.f32 %v2091_v33, %v4139_v58  ;;  %v2403_v44 = vadd.f32 %v2402_v19, %v2401_v16 }
 0x6c9   : > { %2129 = vst [vmem:[%s3960_s6 + $0x10] sm:$0xff] %v2121_v49  ;;  %v2096_v47 = vadd.f32 %v2403_v44, %v2320_v14 }
 0x6cb   : > { %v2122_v13 = vadd.f32 %v2096_v47, %v4140_v5 }
 0x6cd   : > { %2130 = vst [vmem:[%s3960_s6 + $0x18] sm:$0xff] %v2122_v13 }
 0x6d5   : > { %v2404_v48 = vpop.f32.mrf.mxu1 }
 0x6d7   : > { %v2405_v57 = vpop.f32.mrf.mxu1 }
 0x6d8   : > { %v2406_v60 = vadd.f32 %v2405_v57, %v2404_v48 }
 0x6d9   : > { %v2407_v22 = vpop.f32.mrf.mxu1 }
 0x6da   : > { %v2101_v9 = vadd.f32 %v2406_v60, %v2320_v14 }
 0x6db   : > { %v2408_v10 = vpop.f32.mrf.mxu1 }
 0x6dc   : > { %v2123_v63 = vadd.f32 %v2101_v9, %v4141_v37  ;;  %v2409_v39 = vadd.f32 %v2408_v10, %v2407_v22 }
 0x6dd   : > { %v2410_v55 = vpop.f32.mrf.mxu1 }
 0x6de   : > { %2131 = vst [vmem:[%s3960_s6 + $0x20] sm:$0xff] %v2123_v63  ;;  %v2106_v59 = vadd.f32 %v2409_v39, %v2320_v14 }
 0x6df   : > { %v2411_v31 = vpop.f32.mrf.mxu1 }
 0x6e0   : > { %v2124_v38 = vadd.f32 %v2106_v59, %v4142_v29  ;;  %v2412_v18 = vadd.f32 %v2411_v31, %v2410_v55 }
 0x6e2   : > { %2132 = vst [vmem:[%s3960_s6 + $0x28] sm:$0xff] %v2124_v38  ;;  %v2111_v56 = vadd.f32 %v2412_v18, %v2320_v14 }
 0x6e3   : > { %v2413_v41 = vpop.f32.mrf.mxu1 }
 0x6e4   : > { %v2125_v15 = vadd.f32 %v2111_v56, %v4143_v26 }
 0x6e5   : > { %v2414_v25 = vpop.f32.mrf.mxu1 }
 0x6e6   : > { %v2415_v1 = vadd.f32 %v2414_v25, %v2413_v41  ;;  %2133 = vst [vmem:[%s3960_s6 + $0x30] sm:$0xff] %v2125_v15 }
 0x6e8   : > { %v2116_v4 = vadd.f32 %v2415_v1, %v2320_v14 }
 0x6ea   : > { %v2126_v17 = vadd.f32 %v2116_v4, %v4144_v35 }
 0x6ec   : > { %2134 = vst [vmem:[%s3960_s6 + $0x38] sm:$0xff] %v2126_v17 }
 0x6ed   : > { %2914 = shalt.err (!%p2911_p3)
}
 0x6ee   : > { %s2915_s23 = scalar_lea.hbm %s3980_s9, 1024  ;;  %s2919_s18 = scalar_lea.hbm %s4040_s13, 2048 }
 0x6ef   : > { %p2916_p4 = scmp.ne.s32.totalorder %s3980_s9, %s2915_s23  ;;  %p2920_p0 = scmp.lt.s32.totalorder %s3980_s9, %s4040_s13 }
 0x6f0   : > { %p2921_p7 = scmp.lt.s32.totalorder %s2919_s18, %s2915_s23 }
 0x6f1   : > { %p2917_p6 = pnand %p2916_p4, %p4145_p8 }
 0x6f2   : > { %p2922_p2 = por %p2921_p7, %p2920_p0 }
 0x6f3   : > { %p2918_p12 = pneg %p2917_p6 }
 0x6f5   : > { %p2923_p9 = pnand %p2922_p2, %p2918_p12 }
 0x6f7   : > { %2926 = shalt.err (!%p2923_p9)
}
 0x6f8   : > { %s2993_s6 = smov 128   ;;  %s2994_s21 = smov 8  }
 0x6f9   : > { %2498 = dma.vmem_to_hbm [thread:$0]  (%p4145_p8), %s3982_s16, 1024, %s3980_s9, %s2136_s15, %s2993_s6, %s2993_s6, %s2994_s21  }
 0x6fa PF: > { %s2164_s11 = sand.u32 1, %s2965_s25   ;;  %p4146_p10 = scmp.ne.s32.totalorder %s4093_s20, 0 }
 0x6fb   : > { %p4147_p11 = scmp.ge.s32.totalorder %s2977_s28, 2  ;;  %s2165_s8 = scalar_lea.sflag [#allocation4], %s2164_s11 }
 0x6fd   : > { %p2524_p13 = pnand %p4147_p11, %p4146_p10 }
 0x6ff   : > { %p2525_p5 = pneg %p2524_p13 }
 0x701   : > { %2960 = dma.done.wait (%p2525_p5), %s2165_s8, 1024  }
 0x702   : > { %2962 = vsyncadd (%p2525_p5), %s2165_s8, 4294966272  ;;  %s4148_s28 = sld [smem:[#allocation21_spill]]  ;;  %s4151_s25 = smov %s2969_s26 }
 0x703   : > { %s4149_s30 = sld [smem:[#allocation20_spill]] }
 0x704   : > { %s4150_s27 = sld [smem:[#allocation22_spill]] }
 0x708   : > { %p29_p1 = scmp.ge.s32.totalorder %s4148_s28, 4  }
 0x709   : > { %s4152_s26 = smov %s4149_s30 }
 0x70a   :  { %31 = sbr.rel (!%p29_p1) target bundleno = 15 (0xf), region = 141 }
 0x70f   :  { %2170 = vsyncpa [#allocation3], 1 }
 0x710   :  { %2172 = vsyncpa [#allocation3 + $0x1], 1 }
 0x711   :  { %2173 = vsyncpa [#allocation6], 1 }
 0x712   :  { %2174 = vsyncpa [#allocation9], 1 }
 0x713   :  { %2175 = vsyncpa [#allocation12], 1 }
 0x714   :  { %2176 = vsyncpa [#allocation4], 1 }
 0x715   :  { %2178 = vsyncpa [#allocation4 + $0x1], 1 }

</bundles_post_ra>
